<compile_context>
chip_gen: v5e
topology: v5e:2x2
jax: 0.10.0
libtpu: 0.0.40
codegen_flags: <defaults>
</compile_context>

<pallas_src>
import functools

import jax
import jax.numpy as jnp
from jax import lax
from jax.experimental import pallas as pl
from jax.experimental.pallas import tpu as pltpu


def _round_up(x, m):
    return ((x + m - 1) // m) * m


def _vmem_limit(nbytes):
    """Scoped-VMEM limit sized from the actual blocks, with headroom."""
    return int(max(16 << 20, min(2 * nbytes + (4 << 20), 64 << 20)))


def _pick_tm(m, target=512):
    """Largest row tile <= target that divides m (multiple of 8 if tiled)."""
    if m <= target:
        return m
    for t in range(target, 7, -1):
        if t % 8 == 0 and m % t == 0:
            return t
    return m  # fallback: single block (rare)


def _pick_windows_per_block(num_windows, window_size, target_rows=512):
    """Largest #windows per grid step whose row count is <= target_rows and
    satisfies the (8,128) sublane constraint."""
    for wpb in range(num_windows, 0, -1):
        rows = wpb * window_size
        if (num_windows % wpb == 0 and rows <= target_rows
                and (rows % 8 == 0 or wpb == num_windows)):
            return wpb
    return num_windows


# --------------------------- tiled linear (embedding / classifier) ----------

def _linear_kernel(x_ref, w_ref, b_ref, o_ref):
    y = jnp.dot(x_ref[...], w_ref[...], preferred_element_type=jnp.float32)
    o_ref[...] = (y + b_ref[...]).astype(o_ref.dtype)


def pallas_linear(x, w, b, *, out_dtype, tm_target=512):
    """x: (M, K) bf16, w: (K, Nout) bf16, b: (Nout,) f32 -> (M, Nout).

    Rows are tiled with a tile that divides M (no host-side padding copy);
    the weight / bias stay VMEM-resident across the whole grid.
    """
    M, K = x.shape
    n_out = w.shape[1]
    tm = _pick_tm(M, tm_target)
    nbytes = (2 * (tm * K * x.dtype.itemsize
                   + tm * n_out * jnp.dtype(out_dtype).itemsize)
              + K * n_out * w.dtype.itemsize + n_out * 4)
    return pl.pallas_call(
        _linear_kernel,
        out_shape=jax.ShapeDtypeStruct((M, n_out), out_dtype),
        grid=(M // tm,),
        in_specs=[pl.BlockSpec((tm, K), lambda i: (i, 0)),
                  pl.BlockSpec((K, n_out), lambda i: (0, 0)),   # resident weight
                  pl.BlockSpec((1, n_out), lambda i: (0, 0))],  # resident bias
        out_specs=pl.BlockSpec((tm, n_out), lambda i: (i, 0)),
        compiler_params=pltpu.CompilerParams(
            dimension_semantics=("parallel",),
            vmem_limit_bytes=_vmem_limit(nbytes)),
    )(x, w, b.reshape(1, n_out))


# --------------------------- fused transformer layer -------------------------

def _layer_kernel(x_ref, m_ref, wqkv_ref, wo_ref, bo_ref, g1_ref, b1_ref,
                  w1_ref, bb1_ref, w2_ref, bb2_ref, g2_ref, b2_ref, o_ref, *,
                  heads, head_dim, window_size, windows_per_block,
                  inv_scale, eps):
    E = heads * head_dim
    Ws = window_size
    WB = windows_per_block * Ws

    x_bf = x_ref[0]                                   # (WB, E) bf16 (matmuls)
    x_f32 = x_bf.astype(jnp.float32)                  # residual in f32

    # ---- fused QKV projection: one lane-dense bf16 MXU matmul ----
    qkv = jnp.dot(x_bf, wqkv_ref[...],
                  preferred_element_type=jnp.float32)            # (WB, 3E) f32
    q = qkv[:, :E] * inv_scale          # fold 1/sqrt(embed_size) into q
    k = qkv[:, E:2 * E]
    v = qkv[:, 2 * E:]

    # Query-row mask for this slab (broadcast over keys, as in the reference).
    keep = m_ref[0] > 0.0                                        # (WB, 1) bool
    # Reference fills energies with -1e20 BEFORE dividing by sqrt(E); the
    # equivalent fill value for the pre-scaled scores:
    neg = jnp.float32(-1e20 * inv_scale)

    wo = wo_ref[...]                                             # (E, E) bf16

    # ---- local (block-diagonal) attention, accumulated straight into the
    #      output projection (no lane-dim concat of head slices) ----
    z = jnp.zeros((WB, E), jnp.float32)
    for h in range(heads):                       # small static loops, unrolled
        sl = slice(h * head_dim, (h + 1) * head_dim)
        qh, kh, vh = q[:, sl], k[:, sl], v[:, sl]
        outs = []
        for w in range(windows_per_block):
            rows = slice(w * Ws, (w + 1) * Ws)
            s = lax.dot_general(qh[rows, :], kh[rows, :],
                                (((1,), (1,)), ((), ())),
                                preferred_element_type=jnp.float32)  # (Ws, Ws)
            s = jnp.where(keep[rows, :], s, neg)
            s = s - jnp.max(s, axis=-1, keepdims=True)
            p = jnp.exp(s)
            p = p * pl.reciprocal(jnp.sum(p, axis=-1, keepdims=True),
                                  approx=True)
            outs.append(jnp.dot(p, vh[rows, :],
                                preferred_element_type=jnp.float32))  # (Ws, D)
        out_h = outs[0] if windows_per_block == 1 else jnp.concatenate(outs, 0)
        z = z + jnp.dot(out_h.astype(jnp.bfloat16), wo[sl, :],
                        preferred_element_type=jnp.float32)         # (WB, E)

    # ---- output bias + residual + LayerNorm1 ----
    z = z + bo_ref[...] + x_f32
    mean = jnp.mean(z, axis=-1, keepdims=True)
    var = jnp.mean(jnp.square(z - mean), axis=-1, keepdims=True)
    y1 = (z - mean) * lax.rsqrt(var + eps) * g1_ref[...] + b1_ref[...]

    # ---- FFN + residual + LayerNorm2 (hidden activation stays in VMEM) ----
    ff = jnp.dot(y1.astype(jnp.bfloat16), w1_ref[...],
                 preferred_element_type=jnp.float32) + bb1_ref[...]
    ff = jnp.maximum(ff, 0.0)
    z2 = (jnp.dot(ff.astype(jnp.bfloat16), w2_ref[...],
                  preferred_element_type=jnp.float32)
          + bb2_ref[...] + y1)
    mean2 = jnp.mean(z2, axis=-1, keepdims=True)
    var2 = jnp.mean(jnp.square(z2 - mean2), axis=-1, keepdims=True)
    y2 = (z2 - mean2) * lax.rsqrt(var2 + eps) * g2_ref[...] + b2_ref[...]
    o_ref[0] = y2.astype(o_ref.dtype)


def pallas_layer_block(x, mask3, lp, *, heads, head_dim, window_size,
                       eps=1e-5):
    """One fused TransformerBlock.  x: (N, L, E) bf16; mask3: (N, L, 1) f32."""
    N, L, E = x.shape
    assert L % window_size == 0, "seq_len must be a multiple of window_size"
    num_windows = L // window_size
    wpb = _pick_windows_per_block(num_windows, window_size)
    WB = wpb * window_size
    H = lp["w1"].shape[1]

    kernel = functools.partial(
        _layer_kernel, heads=heads, head_dim=head_dim,
        window_size=window_size, windows_per_block=wpb,
        inv_scale=1.0 / (float(E) ** 0.5), eps=eps)

    nbytes = (2 * (2 * WB * E * 2 + WB * 4)                 # x/out blocks + mask
              + (3 * E * E + E * E + E * H + H * E) * 2     # bf16 weights
              + (6 * E + H) * 4)                            # f32 biases / LN
    return pl.pallas_call(
        kernel,
        out_shape=jax.ShapeDtypeStruct((N, L, E), x.dtype),
        grid=(N, num_windows // wpb),
        in_specs=[
            pl.BlockSpec((1, WB, E), lambda n, b: (n, b, 0)),   # x slab
            pl.BlockSpec((1, WB, 1), lambda n, b: (n, b, 0)),   # query-row mask
            pl.BlockSpec((E, 3 * E), lambda n, b: (0, 0)),      # fused QKV (bf16)
            pl.BlockSpec((E, E), lambda n, b: (0, 0)),          # out proj (bf16)
            pl.BlockSpec((1, E), lambda n, b: (0, 0)),          # out bias
            pl.BlockSpec((1, E), lambda n, b: (0, 0)),          # LN1 gamma
            pl.BlockSpec((1, E), lambda n, b: (0, 0)),          # LN1 beta
            pl.BlockSpec((E, H), lambda n, b: (0, 0)),          # FFN w1 (bf16)
            pl.BlockSpec((1, H), lambda n, b: (0, 0)),          # FFN b1
            pl.BlockSpec((H, E), lambda n, b: (0, 0)),          # FFN w2 (bf16)
            pl.BlockSpec((1, E), lambda n, b: (0, 0)),          # FFN b2
            pl.BlockSpec((1, E), lambda n, b: (0, 0)),          # LN2 gamma
            pl.BlockSpec((1, E), lambda n, b: (0, 0)),          # LN2 beta
        ],
        out_specs=pl.BlockSpec((1, WB, E), lambda n, b: (n, b, 0)),
        compiler_params=pltpu.CompilerParams(
            dimension_semantics=("parallel", "parallel"),
            vmem_limit_bytes=_vmem_limit(nbytes)),
    )(x, mask3, lp["w_qkv"], lp["w_o"], lp["b_o"].reshape(1, E),
      lp["g1"].reshape(1, E), lp["b1"].reshape(1, E),
      lp["w1"], lp["bb1"].reshape(1, H), lp["w2"], lp["bb2"].reshape(1, E),
      lp["g2"].reshape(1, E), lp["b2"].reshape(1, E))


# --------------------------- model glue --------------------------------------

def transformer_forward(params, x, mask, *, embed_size, heads, window_size,
                        num_classes):
    N, L, input_size = x.shape
    head_dim = embed_size // heads
    compute_dtype = jnp.bfloat16

    # Embedding: bf16 matmul operands, bf16 activation for the layer stack.
    h = pallas_linear(x.astype(compute_dtype).reshape(N * L, input_size),
                      params["emb_w"], params["emb_b"],
                      out_dtype=compute_dtype)
    h = h.reshape(N, L, embed_size)

    mask3 = mask.reshape(N, L, 1).astype(jnp.float32)
    for lp in params["layers"]:
        # Dropout is identity in eval mode.
        h = pallas_layer_block(h, mask3, lp, heads=heads, head_dim=head_dim,
                               window_size=window_size)

    # Classifier: lane-dense padded output, f32 logits, slice on the host.
    nc_pad = params["fc_w"].shape[1]
    out = pallas_linear(h.reshape(N * L, embed_size),
                        params["fc_w"], params["fc_b"], out_dtype=jnp.float32)
    return out.reshape(N, L, nc_pad)[..., :num_classes]


# --------------------------- deterministic init ------------------------------

def init_params(key, *, input_size, embed_size, heads, num_layers,
                forward_expansion, num_classes):
    head_dim = embed_size // heads
    keys = iter(jax.random.split(key, 4 + num_layers * 8))
    wdt = jnp.bfloat16   # matmul weights stored bf16 (cast once, not per step)

    def lin(kin, kout):
        return jax.random.normal(next(keys), (kin, kout), jnp.float32) * 0.05

    def head_block_diag(w):
        # shared per-head (D, D) projection applied to every head slice
        # == block-diagonal (E, E) matrix acting on the full embedding.
        return jnp.kron(jnp.eye(heads, dtype=w.dtype), w)

    # Classifier padded to a lane-dense 128-wide output (extra cols are zero).
    nc_pad = _round_up(num_classes, 128)
    fc_w = jnp.zeros((embed_size, nc_pad), jnp.float32)
    fc_w = fc_w.at[:, :num_classes].set(lin(embed_size, num_classes))

    params = {
        "emb_w": lin(input_size, embed_size).astype(wdt),
        "emb_b": jnp.zeros((embed_size,), jnp.float32),
        "fc_w": fc_w.astype(wdt),
        "fc_b": jnp.zeros((nc_pad,), jnp.float32),
        "layers": [],
    }
    hidden = forward_expansion * embed_size
    for _ in range(num_layers):
        wq = lin(head_dim, head_dim)
        wk = lin(head_dim, head_dim)
        wv = lin(head_dim, head_dim)
        params["layers"].append({
            # fused (E, 3E) QKV weight -> single MXU matmul in the kernel
            # (for heads >= 8 / large E keep the tiny shared (D, 3D) instead)
            "w_qkv": jnp.concatenate([head_block_diag(wq),
                                      head_block_diag(wk),
                                      head_block_diag(wv)], axis=1).astype(wdt),
            "w_o": lin(embed_size, embed_size).astype(wdt),
            "b_o": jnp.zeros((embed_size,), jnp.float32),
            "g1": jnp.ones((embed_size,), jnp.float32),
            "b1": jnp.zeros((embed_size,), jnp.float32),
            "g2": jnp.ones((embed_size,), jnp.float32),
            "b2": jnp.zeros((embed_size,), jnp.float32),
            "w1": lin(embed_size, hidden).astype(wdt),
            "bb1": jnp.zeros((hidden,), jnp.float32),
            "w2": lin(hidden, embed_size).astype(wdt),
            "bb2": jnp.zeros((embed_size,), jnp.float32),
        })
    return params


# --------------------------- demo -------------------------------------------

if __name__ == "__main__":
    N, L = 2, 16
    input_size, embed_size, heads = 16, 32, 4
    window_size, forward_expansion = 8, 2
    num_layers, num_classes = 2, 10

    key = jax.random.PRNGKey(0)
    kp, kx, km = jax.random.split(key, 3)

    params = init_params(kp, input_size=input_size, embed_size=embed_size,
                         heads=heads, num_layers=num_layers,
                         forward_expansion=forward_expansion,
                         num_classes=num_classes)

    x = jax.random.normal(kx, (N, L, input_size), jnp.float32)
    mask = (jax.random.uniform(km, (N, L)) > 0.2).astype(jnp.float32)

    fwd = jax.jit(functools.partial(transformer_forward,
                                    embed_size=embed_size, heads=heads,
                                    window_size=window_size,
                                    num_classes=num_classes))
    out = jax.block_until_ready(fwd(params, x, mask))

    assert out.shape == (N, L, num_classes), out.shape
    assert bool(jnp.all(jnp.isfinite(out)))
    print("KERNEL_OK")
</pallas_src>

<mosaic_0001>
module attributes {stable_mosaic.version = 11 : i64} {
  func.func @_linear_kernel(%arg0: i32, %arg1: memref<32x16xbf16, #tpu.memory_space<vmem>>, %arg2: memref<16x32xbf16, #tpu.memory_space<vmem>>, %arg3: memref<1x32xf32, #tpu.memory_space<vmem>>, %arg4: memref<32x32xbf16, #tpu.memory_space<vmem>>) attributes {dimension_semantics = [#tpu.dimension_semantics<parallel>], iteration_bounds = array<i64: 1>, scalar_prefetch = 0 : i64, scratch_operands = 0 : i64, tpu.core_type = #tpu.core_type<tc>, window_params = [{transform_indices = @transform_0, window_bounds = array<i64: 32, 16>}, {pipeline_mode = #tpu.pipeline_mode<synchronous>, transform_indices = @transform_1, window_bounds = array<i64: 16, 32>}, {pipeline_mode = #tpu.pipeline_mode<synchronous>, transform_indices = @transform_2, window_bounds = array<i64: 1, 32>}, {transform_indices = @transform_3, window_bounds = array<i64: 32, 32>}]} {
    %c0 = arith.constant 0 : index
    %c0_0 = arith.constant 0 : index
    %0 = vector.load %arg1[%c0, %c0_0] : memref<32x16xbf16, #tpu.memory_space<vmem>>, vector<32x16xbf16>
    %c0_1 = arith.constant 0 : index
    %c0_2 = arith.constant 0 : index
    %1 = vector.load %arg2[%c0_1, %c0_2] : memref<16x32xbf16, #tpu.memory_space<vmem>>, vector<16x32xbf16>
    %cst = arith.constant dense<0.000000e+00> : vector<32x32xf32>
    %2 = tpu.matmul %0, %1, %cst {dimension_numbers = #tpu.dot_dimension_numbers<[1], [0], [0], [1], [0, 0, 1, 1], [], []>} : vector<32x16xbf16>, vector<16x32xbf16>, vector<32x32xf32> -> vector<32x32xf32>
    %c0_3 = arith.constant 0 : index
    %c0_4 = arith.constant 0 : index
    %3 = vector.load %arg3[%c0_3, %c0_4] : memref<1x32xf32, #tpu.memory_space<vmem>>, vector<1x32xf32>
    %4 = vector.broadcast %3 : vector<1x32xf32> to vector<32x32xf32>
    %5 = arith.addf %2, %4 : vector<32x32xf32>
    %6 = arith.truncf %5 : vector<32x32xf32> to vector<32x32xbf16>
    %c0_5 = arith.constant 0 : index
    %c0_6 = arith.constant 0 : index
    %7 = vector.load %arg4[%c0_5, %c0_6] : memref<32x32xbf16, #tpu.memory_space<vmem>>, vector<32x32xbf16>
    tpu.vector_store %arg4[%c0_5, %c0_6], %6 {strides = array<i32>} : memref<32x32xbf16, #tpu.memory_space<vmem>>, vector<32x32xbf16>,
    return
  }
  func.func @transform_0(%arg0: i32) -> (i32, i32) {
    %c0_i32 = arith.constant 0 : i32
    %c0_i32_0 = arith.constant 0 : i32
    return %arg0, %c0_i32 : i32, i32
  }
  func.func @transform_1(%arg0: i32) -> (i32, i32) {
    %c0_i32 = arith.constant 0 : i32
    %c0_i32_0 = arith.constant 0 : i32
    %c0_i32_1 = arith.constant 0 : i32
    return %c0_i32, %c0_i32_0 : i32, i32
  }
  func.func @transform_2(%arg0: i32) -> (i32, i32) {
    %c0_i32 = arith.constant 0 : i32
    %c0_i32_0 = arith.constant 0 : i32
    %c0_i32_1 = arith.constant 0 : i32
    return %c0_i32, %c0_i32_0 : i32, i32
  }
  func.func @transform_3(%arg0: i32) -> (i32, i32) {
    %c0_i32 = arith.constant 0 : i32
    %c0_i32_0 = arith.constant 0 : i32
    return %arg0, %c0_i32 : i32, i32
  }
}

module attributes {stable_mosaic.version = 11 : i64} {
  func.func @_linear_kernel(%arg0: i32, %arg1: memref<32x32xbf16, #tpu.memory_space<vmem>>, %arg2: memref<32x128xbf16, #tpu.memory_space<vmem>>, %arg3: memref<1x128xf32, #tpu.memory_space<vmem>>, %arg4: memref<32x128xf32, #tpu.memory_space<vmem>>) attributes {dimension_semantics = [#tpu.dimension_semantics<parallel>], iteration_bounds = array<i64: 1>, scalar_prefetch = 0 : i64, scratch_operands = 0 : i64, tpu.core_type = #tpu.core_type<tc>, window_params = [{transform_indices = @transform_0, window_bounds = array<i64: 32, 32>}, {pipeline_mode = #tpu.pipeline_mode<synchronous>, transform_indices = @transform_1, window_bounds = array<i64: 32, 128>}, {pipeline_mode = #tpu.pipeline_mode<synchronous>, transform_indices = @transform_2, window_bounds = array<i64: 1, 128>}, {transform_indices = @transform_3, window_bounds = array<i64: 32, 128>}]} {
    %c0 = arith.constant 0 : index
    %c0_0 = arith.constant 0 : index
    %0 = vector.load %arg1[%c0, %c0_0] : memref<32x32xbf16, #tpu.memory_space<vmem>>, vector<32x32xbf16>
    %c0_1 = arith.constant 0 : index
    %c0_2 = arith.constant 0 : index
    %1 = vector.load %arg2[%c0_1, %c0_2] : memref<32x128xbf16, #tpu.memory_space<vmem>>, vector<32x128xbf16>
    %cst = arith.constant dense<0.000000e+00> : vector<32x128xf32>
    %2 = tpu.matmul %0, %1, %cst {dimension_numbers = #tpu.dot_dimension_numbers<[1], [0], [0], [1], [0, 0, 1, 1], [], []>} : vector<32x32xbf16>, vector<32x128xbf16>, vector<32x128xf32> -> vector<32x128xf32>
    %c0_3 = arith.constant 0 : index
    %c0_4 = arith.constant 0 : index
    %3 = vector.load %arg3[%c0_3, %c0_4] : memref<1x128xf32, #tpu.memory_space<vmem>>, vector<1x128xf32>
    %4 = vector.broadcast %3 : vector<1x128xf32> to vector<32x128xf32>
    %5 = arith.addf %2, %4 : vector<32x128xf32>
    %c0_5 = arith.constant 0 : index
    %c0_6 = arith.constant 0 : index
    %6 = vector.load %arg4[%c0_5, %c0_6] : memref<32x128xf32, #tpu.memory_space<vmem>>, vector<32x128xf32>
    tpu.vector_store %arg4[%c0_5, %c0_6], %5 {strides = array<i32>} : memref<32x128xf32, #tpu.memory_space<vmem>>, vector<32x128xf32>,
    return
  }
  func.func @transform_0(%arg0: i32) -> (i32, i32) {
    %c0_i32 = arith.constant 0 : i32
    %c0_i32_0 = arith.constant 0 : i32
    return %arg0, %c0_i32 : i32, i32
  }
  func.func @transform_1(%arg0: i32) -> (i32, i32) {
    %c0_i32 = arith.constant 0 : i32
    %c0_i32_0 = arith.constant 0 : i32
    %c0_i32_1 = arith.constant 0 : i32
    return %c0_i32, %c0_i32_0 : i32, i32
  }
  func.func @transform_2(%arg0: i32) -> (i32, i32) {
    %c0_i32 = arith.constant 0 : i32
    %c0_i32_0 = arith.constant 0 : i32
    %c0_i32_1 = arith.constant 0 : i32
    return %c0_i32, %c0_i32_0 : i32, i32
  }
  func.func @transform_3(%arg0: i32) -> (i32, i32) {
    %c0_i32 = arith.constant 0 : i32
    %c0_i32_0 = arith.constant 0 : i32
    return %arg0, %c0_i32 : i32, i32
  }
}

module attributes {stable_mosaic.version = 11 : i64} {
  func.func @_layer_kernel(%arg0: i32, %arg1: i32, %arg2: memref<1x16x32xbf16, #tpu.memory_space<vmem>>, %arg3: memref<1x16x1xf32, #tpu.memory_space<vmem>>, %arg4: memref<32x96xbf16, #tpu.memory_space<vmem>>, %arg5: memref<32x32xbf16, #tpu.memory_space<vmem>>, %arg6: memref<1x32xf32, #tpu.memory_space<vmem>>, %arg7: memref<1x32xf32, #tpu.memory_space<vmem>>, %arg8: memref<1x32xf32, #tpu.memory_space<vmem>>, %arg9: memref<32x64xbf16, #tpu.memory_space<vmem>>, %arg10: memref<1x64xf32, #tpu.memory_space<vmem>>, %arg11: memref<64x32xbf16, #tpu.memory_space<vmem>>, %arg12: memref<1x32xf32, #tpu.memory_space<vmem>>, %arg13: memref<1x32xf32, #tpu.memory_space<vmem>>, %arg14: memref<1x32xf32, #tpu.memory_space<vmem>>, %arg15: memref<1x16x32xbf16, #tpu.memory_space<vmem>>) attributes {dimension_semantics = [#tpu.dimension_semantics<parallel>, #tpu.dimension_semantics<parallel>], iteration_bounds = array<i64: 2, 1>, scalar_prefetch = 0 : i64, scratch_operands = 0 : i64, tpu.core_type = #tpu.core_type<tc>, window_params = [{transform_indices = @transform_0, window_bounds = array<i64: 1, 16, 32>}, {transform_indices = @transform_1, window_bounds = array<i64: 1, 16, 1>}, {pipeline_mode = #tpu.pipeline_mode<synchronous>, transform_indices = @transform_2, window_bounds = array<i64: 32, 96>}, {pipeline_mode = #tpu.pipeline_mode<synchronous>, transform_indices = @transform_3, window_bounds = array<i64: 32, 32>}, {pipeline_mode = #tpu.pipeline_mode<synchronous>, transform_indices = @transform_4, window_bounds = array<i64: 1, 32>}, {pipeline_mode = #tpu.pipeline_mode<synchronous>, transform_indices = @transform_5, window_bounds = array<i64: 1, 32>}, {pipeline_mode = #tpu.pipeline_mode<synchronous>, transform_indices = @transform_6, window_bounds = array<i64: 1, 32>}, {pipeline_mode = #tpu.pipeline_mode<synchronous>, transform_indices = @transform_7, window_bounds = array<i64: 32, 64>}, {pipeline_mode = #tpu.pipeline_mode<synchronous>, transform_indices = @transform_8, window_bounds = array<i64: 1, 64>}, {pipeline_mode = #tpu.pipeline_mode<synchronous>, transform_indices = @transform_9, window_bounds = array<i64: 64, 32>}, {pipeline_mode = #tpu.pipeline_mode<synchronous>, transform_indices = @transform_10, window_bounds = array<i64: 1, 32>}, {pipeline_mode = #tpu.pipeline_mode<synchronous>, transform_indices = @transform_11, window_bounds = array<i64: 1, 32>}, {pipeline_mode = #tpu.pipeline_mode<synchronous>, transform_indices = @transform_12, window_bounds = array<i64: 1, 32>}, {transform_indices = @transform_13, window_bounds = array<i64: 1, 16, 32>}]} {
    %c0 = arith.constant 0 : index
    %c0_0 = arith.constant 0 : index
    %c0_1 = arith.constant 0 : index
    %0 = vector.load %arg2[%c0, %c0_0, %c0_1] : memref<1x16x32xbf16, #tpu.memory_space<vmem>>, vector<1x16x32xbf16>
    %1 = vector.shape_cast %0 : vector<1x16x32xbf16> to vector<16x32xbf16>
    %2 = arith.extf %1 : vector<16x32xbf16> to vector<16x32xf32>
    %c0_2 = arith.constant 0 : index
    %c0_3 = arith.constant 0 : index
    %3 = vector.load %arg4[%c0_2, %c0_3] : memref<32x96xbf16, #tpu.memory_space<vmem>>, vector<32x96xbf16>
    %cst = arith.constant dense<0.000000e+00> : vector<16x96xf32>
    %4 = tpu.matmul %1, %3, %cst {dimension_numbers = #tpu.dot_dimension_numbers<[1], [0], [0], [1], [0, 0, 1, 1], [], []>} : vector<16x32xbf16>, vector<32x96xbf16>, vector<16x96xf32> -> vector<16x96xf32>
    %5 = vector.extract_strided_slice %4 {offsets = [0, 0], sizes = [16, 32], strides = [1, 1]} : vector<16x96xf32> to vector<16x32xf32>
    %cst_4 = arith.constant 0.176776692 : f32
    %6 = vector.broadcast %cst_4 : f32 to vector<16x32xf32>
    %7 = arith.mulf %5, %6 : vector<16x32xf32>
    %8 = vector.extract_strided_slice %4 {offsets = [0, 32], sizes = [16, 32], strides = [1, 1]} : vector<16x96xf32> to vector<16x32xf32>
    %9 = vector.extract_strided_slice %4 {offsets = [0, 64], sizes = [16, 32], strides = [1, 1]} : vector<16x96xf32> to vector<16x32xf32>
    %c0_5 = arith.constant 0 : index
    %c0_6 = arith.constant 0 : index
    %c0_7 = arith.constant 0 : index
    %10 = vector.load %arg3[%c0_5, %c0_6, %c0_7] : memref<1x16x1xf32, #tpu.memory_space<vmem>>, vector<1x16x1xf32>
    %11 = vector.shape_cast %10 : vector<1x16x1xf32> to vector<16x1xf32>
    %cst_8 = arith.constant 0.000000e+00 : f32
    %12 = vector.broadcast %cst_8 : f32 to vector<16x1xf32>
    %13 = arith.cmpf ogt, %11, %12 : vector<16x1xf32>
    %c0_9 = arith.constant 0 : index
    %c0_10 = arith.constant 0 : index
    %14 = vector.load %arg5[%c0_9, %c0_10] : memref<32x32xbf16, #tpu.memory_space<vmem>>, vector<32x32xbf16>
    %cst_11 = arith.constant 0.000000e+00 : f32
    %15 = vector.broadcast %cst_11 : f32 to vector<16x32xf32>
    %16 = vector.extract_strided_slice %7 {offsets = [0, 0], sizes = [16, 8], strides = [1, 1]} : vector<16x32xf32> to vector<16x8xf32>
    %17 = vector.extract_strided_slice %8 {offsets = [0, 0], sizes = [16, 8], strides = [1, 1]} : vector<16x32xf32> to vector<16x8xf32>
    %18 = vector.extract_strided_slice %9 {offsets = [0, 0], sizes = [16, 8], strides = [1, 1]} : vector<16x32xf32> to vector<16x8xf32>
    %19 = vector.extract_strided_slice %16 {offsets = [0, 0], sizes = [8, 8], strides = [1, 1]} : vector<16x8xf32> to vector<8x8xf32>
    %20 = vector.extract_strided_slice %17 {offsets = [0, 0], sizes = [8, 8], strides = [1, 1]} : vector<16x8xf32> to vector<8x8xf32>
    %cst_12 = arith.constant dense<0.000000e+00> : vector<8x8xf32>
    %21 = tpu.matmul %19, %20, %cst_12 {dimension_numbers = #tpu.dot_dimension_numbers<[1], [1], [0], [0], [0, 0, 1, 0], [], []>} : vector<8x8xf32>, vector<8x8xf32>, vector<8x8xf32> -> vector<8x8xf32>
    %22 = vector.extract_strided_slice %13 {offsets = [0, 0], sizes = [8, 1], strides = [1, 1]} : vector<16x1xi1> to vector<8x1xi1>
    %cst_13 = arith.constant -1.76776698E+19 : f32
    %23 = vector.shape_cast %22 : vector<8x1xi1> to vector<8x1xi1>
    %24 = vector.broadcast %23 : vector<8x1xi1> to vector<8x8xi1>
    %25 = vector.broadcast %cst_13 : f32 to vector<8x8xf32>
    %26 = arith.select %24, %21, %25 : vector<8x8xi1>, vector<8x8xf32>
    %cst_14 = arith.constant dense<0xFF800000> : vector<8xf32>
    %27 = vector.multi_reduction <maximumf>, %26, %cst_14 [1] : vector<8x8xf32> to vector<8xf32>
    %28 = vector.shape_cast %27 : vector<8xf32> to vector<8x1xf32>
    %29 = vector.broadcast %28 : vector<8x1xf32> to vector<8x8xf32>
    %30 = arith.subf %26, %29 : vector<8x8xf32>
    %31 = math.exp %30 : vector<8x8xf32>
    %cst_15 = arith.constant dense<0.000000e+00> : vector<8xf32>
    %32 = vector.multi_reduction <add>, %31, %cst_15 [1] : vector<8x8xf32> to vector<8xf32>
    %33 = vector.shape_cast %32 : vector<8xf32> to vector<8x1xf32>
    %34 = tpu.reciprocal %33 {approx = true} : vector<8x1xf32> -> vector<8x1xf32>
    %35 = vector.broadcast %34 : vector<8x1xf32> to vector<8x8xf32>
    %36 = arith.mulf %31, %35 : vector<8x8xf32>
    %37 = vector.extract_strided_slice %18 {offsets = [0, 0], sizes = [8, 8], strides = [1, 1]} : vector<16x8xf32> to vector<8x8xf32>
    %cst_16 = arith.constant dense<0.000000e+00> : vector<8x8xf32>
    %38 = tpu.matmul %36, %37, %cst_16 {dimension_numbers = #tpu.dot_dimension_numbers<[1], [0], [0], [1], [0, 0, 1, 1], [], []>} : vector<8x8xf32>, vector<8x8xf32>, vector<8x8xf32> -> vector<8x8xf32>
    %39 = vector.extract_strided_slice %16 {offsets = [8, 0], sizes = [8, 8], strides = [1, 1]} : vector<16x8xf32> to vector<8x8xf32>
    %40 = vector.extract_strided_slice %17 {offsets = [8, 0], sizes = [8, 8], strides = [1, 1]} : vector<16x8xf32> to vector<8x8xf32>
    %cst_17 = arith.constant dense<0.000000e+00> : vector<8x8xf32>
    %41 = tpu.matmul %39, %40, %cst_17 {dimension_numbers = #tpu.dot_dimension_numbers<[1], [1], [0], [0], [0, 0, 1, 0], [], []>} : vector<8x8xf32>, vector<8x8xf32>, vector<8x8xf32> -> vector<8x8xf32>
    %42 = vector.extract_strided_slice %13 {offsets = [8, 0], sizes = [8, 1], strides = [1, 1]} : vector<16x1xi1> to vector<8x1xi1>
    %cst_18 = arith.constant -1.76776698E+19 : f32
    %43 = vector.shape_cast %42 : vector<8x1xi1> to vector<8x1xi1>
    %44 = vector.broadcast %43 : vector<8x1xi1> to vector<8x8xi1>
    %45 = vector.broadcast %cst_18 : f32 to vector<8x8xf32>
    %46 = arith.select %44, %41, %45 : vector<8x8xi1>, vector<8x8xf32>
    %cst_19 = arith.constant dense<0xFF800000> : vector<8xf32>
    %47 = vector.multi_reduction <maximumf>, %46, %cst_19 [1] : vector<8x8xf32> to vector<8xf32>
    %48 = vector.shape_cast %47 : vector<8xf32> to vector<8x1xf32>
    %49 = vector.broadcast %48 : vector<8x1xf32> to vector<8x8xf32>
    %50 = arith.subf %46, %49 : vector<8x8xf32>
    %51 = math.exp %50 : vector<8x8xf32>
    %cst_20 = arith.constant dense<0.000000e+00> : vector<8xf32>
    %52 = vector.multi_reduction <add>, %51, %cst_20 [1] : vector<8x8xf32> to vector<8xf32>
    %53 = vector.shape_cast %52 : vector<8xf32> to vector<8x1xf32>
    %54 = tpu.reciprocal %53 {approx = true} : vector<8x1xf32> -> vector<8x1xf32>
    %55 = vector.broadcast %54 : vector<8x1xf32> to vector<8x8xf32>
    %56 = arith.mulf %51, %55 : vector<8x8xf32>
    %57 = vector.extract_strided_slice %18 {offsets = [8, 0], sizes = [8, 8], strides = [1, 1]} : vector<16x8xf32> to vector<8x8xf32>
    %cst_21 = arith.constant dense<0.000000e+00> : vector<8x8xf32>
    %58 = tpu.matmul %56, %57, %cst_21 {dimension_numbers = #tpu.dot_dimension_numbers<[1], [0], [0], [1], [0, 0, 1, 1], [], []>} : vector<8x8xf32>, vector<8x8xf32>, vector<8x8xf32> -> vector<8x8xf32>
    %59 = tpu.concatenate %38, %58 in 0 : vector<8x8xf32>, vector<8x8xf32> -> vector<16x8xf32>
    %60 = arith.truncf %59 : vector<16x8xf32> to vector<16x8xbf16>
    %61 = vector.extract_strided_slice %14 {offsets = [0, 0], sizes = [8, 32], strides = [1, 1]} : vector<32x32xbf16> to vector<8x32xbf16>
    %cst_22 = arith.constant dense<0.000000e+00> : vector<16x32xf32>
    %62 = tpu.matmul %60, %61, %cst_22 {dimension_numbers = #tpu.dot_dimension_numbers<[1], [0], [0], [1], [0, 0, 1, 1], [], []>} : vector<16x8xbf16>, vector<8x32xbf16>, vector<16x32xf32> -> vector<16x32xf32>
    %63 = arith.addf %15, %62 : vector<16x32xf32>
    %64 = vector.extract_strided_slice %7 {offsets = [0, 8], sizes = [16, 8], strides = [1, 1]} : vector<16x32xf32> to vector<16x8xf32>
    %65 = vector.extract_strided_slice %8 {offsets = [0, 8], sizes = [16, 8], strides = [1, 1]} : vector<16x32xf32> to vector<16x8xf32>
    %66 = vector.extract_strided_slice %9 {offsets = [0, 8], sizes = [16, 8], strides = [1, 1]} : vector<16x32xf32> to vector<16x8xf32>
    %67 = vector.extract_strided_slice %64 {offsets = [0, 0], sizes = [8, 8], strides = [1, 1]} : vector<16x8xf32> to vector<8x8xf32>
    %68 = vector.extract_strided_slice %65 {offsets = [0, 0], sizes = [8, 8], strides = [1, 1]} : vector<16x8xf32> to vector<8x8xf32>
    %cst_23 = arith.constant dense<0.000000e+00> : vector<8x8xf32>
    %69 = tpu.matmul %67, %68, %cst_23 {dimension_numbers = #tpu.dot_dimension_numbers<[1], [1], [0], [0], [0, 0, 1, 0], [], []>} : vector<8x8xf32>, vector<8x8xf32>, vector<8x8xf32> -> vector<8x8xf32>
    %70 = vector.extract_strided_slice %13 {offsets = [0, 0], sizes = [8, 1], strides = [1, 1]} : vector<16x1xi1> to vector<8x1xi1>
    %cst_24 = arith.constant -1.76776698E+19 : f32
    %71 = vector.shape_cast %70 : vector<8x1xi1> to vector<8x1xi1>
    %72 = vector.broadcast %71 : vector<8x1xi1> to vector<8x8xi1>
    %73 = vector.broadcast %cst_24 : f32 to vector<8x8xf32>
    %74 = arith.select %72, %69, %73 : vector<8x8xi1>, vector<8x8xf32>
    %cst_25 = arith.constant dense<0xFF800000> : vector<8xf32>
    %75 = vector.multi_reduction <maximumf>, %74, %cst_25 [1] : vector<8x8xf32> to vector<8xf32>
    %76 = vector.shape_cast %75 : vector<8xf32> to vector<8x1xf32>
    %77 = vector.broadcast %76 : vector<8x1xf32> to vector<8x8xf32>
    %78 = arith.subf %74, %77 : vector<8x8xf32>
    %79 = math.exp %78 : vector<8x8xf32>
    %cst_26 = arith.constant dense<0.000000e+00> : vector<8xf32>
    %80 = vector.multi_reduction <add>, %79, %cst_26 [1] : vector<8x8xf32> to vector<8xf32>
    %81 = vector.shape_cast %80 : vector<8xf32> to vector<8x1xf32>
    %82 = tpu.reciprocal %81 {approx = true} : vector<8x1xf32> -> vector<8x1xf32>
    %83 = vector.broadcast %82 : vector<8x1xf32> to vector<8x8xf32>
    %84 = arith.mulf %79, %83 : vector<8x8xf32>
    %85 = vector.extract_strided_slice %66 {offsets = [0, 0], sizes = [8, 8], strides = [1, 1]} : vector<16x8xf32> to vector<8x8xf32>
    %cst_27 = arith.constant dense<0.000000e+00> : vector<8x8xf32>
    %86 = tpu.matmul %84, %85, %cst_27 {dimension_numbers = #tpu.dot_dimension_numbers<[1], [0], [0], [1], [0, 0, 1, 1], [], []>} : vector<8x8xf32>, vector<8x8xf32>, vector<8x8xf32> -> vector<8x8xf32>
    %87 = vector.extract_strided_slice %64 {offsets = [8, 0], sizes = [8, 8], strides = [1, 1]} : vector<16x8xf32> to vector<8x8xf32>
    %88 = vector.extract_strided_slice %65 {offsets = [8, 0], sizes = [8, 8], strides = [1, 1]} : vector<16x8xf32> to vector<8x8xf32>
    %cst_28 = arith.constant dense<0.000000e+00> : vector<8x8xf32>
    %89 = tpu.matmul %87, %88, %cst_28 {dimension_numbers = #tpu.dot_dimension_numbers<[1], [1], [0], [0], [0, 0, 1, 0], [], []>} : vector<8x8xf32>, vector<8x8xf32>, vector<8x8xf32> -> vector<8x8xf32>
    %90 = vector.extract_strided_slice %13 {offsets = [8, 0], sizes = [8, 1], strides = [1, 1]} : vector<16x1xi1> to vector<8x1xi1>
    %cst_29 = arith.constant -1.76776698E+19 : f32
    %91 = vector.shape_cast %90 : vector<8x1xi1> to vector<8x1xi1>
    %92 = vector.broadcast %91 : vector<8x1xi1> to vector<8x8xi1>
    %93 = vector.broadcast %cst_29 : f32 to vector<8x8xf32>
    %94 = arith.select %92, %89, %93 : vector<8x8xi1>, vector<8x8xf32>
    %cst_30 = arith.constant dense<0xFF800000> : vector<8xf32>
    %95 = vector.multi_reduction <maximumf>, %94, %cst_30 [1] : vector<8x8xf32> to vector<8xf32>
    %96 = vector.shape_cast %95 : vector<8xf32> to vector<8x1xf32>
    %97 = vector.broadcast %96 : vector<8x1xf32> to vector<8x8xf32>
    %98 = arith.subf %94, %97 : vector<8x8xf32>
    %99 = math.exp %98 : vector<8x8xf32>
    %cst_31 = arith.constant dense<0.000000e+00> : vector<8xf32>
    %100 = vector.multi_reduction <add>, %99, %cst_31 [1] : vector<8x8xf32> to vector<8xf32>
    %101 = vector.shape_cast %100 : vector<8xf32> to vector<8x1xf32>
    %102 = tpu.reciprocal %101 {approx = true} : vector<8x1xf32> -> vector<8x1xf32>
    %103 = vector.broadcast %102 : vector<8x1xf32> to vector<8x8xf32>
    %104 = arith.mulf %99, %103 : vector<8x8xf32>
    %105 = vector.extract_strided_slice %66 {offsets = [8, 0], sizes = [8, 8], strides = [1, 1]} : vector<16x8xf32> to vector<8x8xf32>
    %cst_32 = arith.constant dense<0.000000e+00> : vector<8x8xf32>
    %106 = tpu.matmul %104, %105, %cst_32 {dimension_numbers = #tpu.dot_dimension_numbers<[1], [0], [0], [1], [0, 0, 1, 1], [], []>} : vector<8x8xf32>, vector<8x8xf32>, vector<8x8xf32> -> vector<8x8xf32>
    %107 = tpu.concatenate %86, %106 in 0 : vector<8x8xf32>, vector<8x8xf32> -> vector<16x8xf32>
    %108 = arith.truncf %107 : vector<16x8xf32> to vector<16x8xbf16>
    %109 = vector.extract_strided_slice %14 {offsets = [8, 0], sizes = [8, 32], strides = [1, 1]} : vector<32x32xbf16> to vector<8x32xbf16>
    %cst_33 = arith.constant dense<0.000000e+00> : vector<16x32xf32>
    %110 = tpu.matmul %108, %109, %cst_33 {dimension_numbers = #tpu.dot_dimension_numbers<[1], [0], [0], [1], [0, 0, 1, 1], [], []>} : vector<16x8xbf16>, vector<8x32xbf16>, vector<16x32xf32> -> vector<16x32xf32>
    %111 = arith.addf %63, %110 : vector<16x32xf32>
    %112 = vector.extract_strided_slice %7 {offsets = [0, 16], sizes = [16, 8], strides = [1, 1]} : vector<16x32xf32> to vector<16x8xf32>
    %113 = vector.extract_strided_slice %8 {offsets = [0, 16], sizes = [16, 8], strides = [1, 1]} : vector<16x32xf32> to vector<16x8xf32>
    %114 = vector.extract_strided_slice %9 {offsets = [0, 16], sizes = [16, 8], strides = [1, 1]} : vector<16x32xf32> to vector<16x8xf32>
    %115 = vector.extract_strided_slice %112 {offsets = [0, 0], sizes = [8, 8], strides = [1, 1]} : vector<16x8xf32> to vector<8x8xf32>
    %116 = vector.extract_strided_slice %113 {offsets = [0, 0], sizes = [8, 8], strides = [1, 1]} : vector<16x8xf32> to vector<8x8xf32>
    %cst_34 = arith.constant dense<0.000000e+00> : vector<8x8xf32>
    %117 = tpu.matmul %115, %116, %cst_34 {dimension_numbers = #tpu.dot_dimension_numbers<[1], [1], [0], [0], [0, 0, 1, 0], [], []>} : vector<8x8xf32>, vector<8x8xf32>, vector<8x8xf32> -> vector<8x8xf32>
    %118 = vector.extract_strided_slice %13 {offsets = [0, 0], sizes = [8, 1], strides = [1, 1]} : vector<16x1xi1> to vector<8x1xi1>
    %cst_35 = arith.constant -1.76776698E+19 : f32
    %119 = vector.shape_cast %118 : vector<8x1xi1> to vector<8x1xi1>
    %120 = vector.broadcast %119 : vector<8x1xi1> to vector<8x8xi1>
    %121 = vector.broadcast %cst_35 : f32 to vector<8x8xf32>
    %122 = arith.select %120, %117, %121 : vector<8x8xi1>, vector<8x8xf32>
    %cst_36 = arith.constant dense<0xFF800000> : vector<8xf32>
    %123 = vector.multi_reduction <maximumf>, %122, %cst_36 [1] : vector<8x8xf32> to vector<8xf32>
    %124 = vector.shape_cast %123 : vector<8xf32> to vector<8x1xf32>
    %125 = vector.broadcast %124 : vector<8x1xf32> to vector<8x8xf32>
    %126 = arith.subf %122, %125 : vector<8x8xf32>
    %127 = math.exp %126 : vector<8x8xf32>
    %cst_37 = arith.constant dense<0.000000e+00> : vector<8xf32>
    %128 = vector.multi_reduction <add>, %127, %cst_37 [1] : vector<8x8xf32> to vector<8xf32>
    %129 = vector.shape_cast %128 : vector<8xf32> to vector<8x1xf32>
    %130 = tpu.reciprocal %129 {approx = true} : vector<8x1xf32> -> vector<8x1xf32>
    %131 = vector.broadcast %130 : vector<8x1xf32> to vector<8x8xf32>
    %132 = arith.mulf %127, %131 : vector<8x8xf32>
    %133 = vector.extract_strided_slice %114 {offsets = [0, 0], sizes = [8, 8], strides = [1, 1]} : vector<16x8xf32> to vector<8x8xf32>
    %cst_38 = arith.constant dense<0.000000e+00> : vector<8x8xf32>
    %134 = tpu.matmul %132, %133, %cst_38 {dimension_numbers = #tpu.dot_dimension_numbers<[1], [0], [0], [1], [0, 0, 1, 1], [], []>} : vector<8x8xf32>, vector<8x8xf32>, vector<8x8xf32> -> vector<8x8xf32>
    %135 = vector.extract_strided_slice %112 {offsets = [8, 0], sizes = [8, 8], strides = [1, 1]} : vector<16x8xf32> to vector<8x8xf32>
    %136 = vector.extract_strided_slice %113 {offsets = [8, 0], sizes = [8, 8], strides = [1, 1]} : vector<16x8xf32> to vector<8x8xf32>
    %cst_39 = arith.constant dense<0.000000e+00> : vector<8x8xf32>
    %137 = tpu.matmul %135, %136, %cst_39 {dimension_numbers = #tpu.dot_dimension_numbers<[1], [1], [0], [0], [0, 0, 1, 0], [], []>} : vector<8x8xf32>, vector<8x8xf32>, vector<8x8xf32> -> vector<8x8xf32>
    %138 = vector.extract_strided_slice %13 {offsets = [8, 0], sizes = [8, 1], strides = [1, 1]} : vector<16x1xi1> to vector<8x1xi1>
    %cst_40 = arith.constant -1.76776698E+19 : f32
    %139 = vector.shape_cast %138 : vector<8x1xi1> to vector<8x1xi1>
    %140 = vector.broadcast %139 : vector<8x1xi1> to vector<8x8xi1>
    %141 = vector.broadcast %cst_40 : f32 to vector<8x8xf32>
    %142 = arith.select %140, %137, %141 : vector<8x8xi1>, vector<8x8xf32>
    %cst_41 = arith.constant dense<0xFF800000> : vector<8xf32>
    %143 = vector.multi_reduction <maximumf>, %142, %cst_41 [1] : vector<8x8xf32> to vector<8xf32>
    %144 = vector.shape_cast %143 : vector<8xf32> to vector<8x1xf32>
    %145 = vector.broadcast %144 : vector<8x1xf32> to vector<8x8xf32>
    %146 = arith.subf %142, %145 : vector<8x8xf32>
    %147 = math.exp %146 : vector<8x8xf32>
    %cst_42 = arith.constant dense<0.000000e+00> : vector<8xf32>
    %148 = vector.multi_reduction <add>, %147, %cst_42 [1] : vector<8x8xf32> to vector<8xf32>
    %149 = vector.shape_cast %148 : vector<8xf32> to vector<8x1xf32>
    %150 = tpu.reciprocal %149 {approx = true} : vector<8x1xf32> -> vector<8x1xf32>
    %151 = vector.broadcast %150 : vector<8x1xf32> to vector<8x8xf32>
    %152 = arith.mulf %147, %151 : vector<8x8xf32>
    %153 = vector.extract_strided_slice %114 {offsets = [8, 0], sizes = [8, 8], strides = [1, 1]} : vector<16x8xf32> to vector<8x8xf32>
    %cst_43 = arith.constant dense<0.000000e+00> : vector<8x8xf32>
    %154 = tpu.matmul %152, %153, %cst_43 {dimension_numbers = #tpu.dot_dimension_numbers<[1], [0], [0], [1], [0, 0, 1, 1], [], []>} : vector<8x8xf32>, vector<8x8xf32>, vector<8x8xf32> -> vector<8x8xf32>
    %155 = tpu.concatenate %134, %154 in 0 : vector<8x8xf32>, vector<8x8xf32> -> vector<16x8xf32>
    %156 = arith.truncf %155 : vector<16x8xf32> to vector<16x8xbf16>
    %157 = vector.extract_strided_slice %14 {offsets = [16, 0], sizes = [8, 32], strides = [1, 1]} : vector<32x32xbf16> to vector<8x32xbf16>
    %cst_44 = arith.constant dense<0.000000e+00> : vector<16x32xf32>
    %158 = tpu.matmul %156, %157, %cst_44 {dimension_numbers = #tpu.dot_dimension_numbers<[1], [0], [0], [1], [0, 0, 1, 1], [], []>} : vector<16x8xbf16>, vector<8x32xbf16>, vector<16x32xf32> -> vector<16x32xf32>
    %159 = arith.addf %111, %158 : vector<16x32xf32>
    %160 = vector.extract_strided_slice %7 {offsets = [0, 24], sizes = [16, 8], strides = [1, 1]} : vector<16x32xf32> to vector<16x8xf32>
    %161 = vector.extract_strided_slice %8 {offsets = [0, 24], sizes = [16, 8], strides = [1, 1]} : vector<16x32xf32> to vector<16x8xf32>
    %162 = vector.extract_strided_slice %9 {offsets = [0, 24], sizes = [16, 8], strides = [1, 1]} : vector<16x32xf32> to vector<16x8xf32>
    %163 = vector.extract_strided_slice %160 {offsets = [0, 0], sizes = [8, 8], strides = [1, 1]} : vector<16x8xf32> to vector<8x8xf32>
    %164 = vector.extract_strided_slice %161 {offsets = [0, 0], sizes = [8, 8], strides = [1, 1]} : vector<16x8xf32> to vector<8x8xf32>
    %cst_45 = arith.constant dense<0.000000e+00> : vector<8x8xf32>
    %165 = tpu.matmul %163, %164, %cst_45 {dimension_numbers = #tpu.dot_dimension_numbers<[1], [1], [0], [0], [0, 0, 1, 0], [], []>} : vector<8x8xf32>, vector<8x8xf32>, vector<8x8xf32> -> vector<8x8xf32>
    %166 = vector.extract_strided_slice %13 {offsets = [0, 0], sizes = [8, 1], strides = [1, 1]} : vector<16x1xi1> to vector<8x1xi1>
    %cst_46 = arith.constant -1.76776698E+19 : f32
    %167 = vector.shape_cast %166 : vector<8x1xi1> to vector<8x1xi1>
    %168 = vector.broadcast %167 : vector<8x1xi1> to vector<8x8xi1>
    %169 = vector.broadcast %cst_46 : f32 to vector<8x8xf32>
    %170 = arith.select %168, %165, %169 : vector<8x8xi1>, vector<8x8xf32>
    %cst_47 = arith.constant dense<0xFF800000> : vector<8xf32>
    %171 = vector.multi_reduction <maximumf>, %170, %cst_47 [1] : vector<8x8xf32> to vector<8xf32>
    %172 = vector.shape_cast %171 : vector<8xf32> to vector<8x1xf32>
    %173 = vector.broadcast %172 : vector<8x1xf32> to vector<8x8xf32>
    %174 = arith.subf %170, %173 : vector<8x8xf32>
    %175 = math.exp %174 : vector<8x8xf32>
    %cst_48 = arith.constant dense<0.000000e+00> : vector<8xf32>
    %176 = vector.multi_reduction <add>, %175, %cst_48 [1] : vector<8x8xf32> to vector<8xf32>
    %177 = vector.shape_cast %176 : vector<8xf32> to vector<8x1xf32>
    %178 = tpu.reciprocal %177 {approx = true} : vector<8x1xf32> -> vector<8x1xf32>
    %179 = vector.broadcast %178 : vector<8x1xf32> to vector<8x8xf32>
    %180 = arith.mulf %175, %179 : vector<8x8xf32>
    %181 = vector.extract_strided_slice %162 {offsets = [0, 0], sizes = [8, 8], strides = [1, 1]} : vector<16x8xf32> to vector<8x8xf32>
    %cst_49 = arith.constant dense<0.000000e+00> : vector<8x8xf32>
    %182 = tpu.matmul %180, %181, %cst_49 {dimension_numbers = #tpu.dot_dimension_numbers<[1], [0], [0], [1], [0, 0, 1, 1], [], []>} : vector<8x8xf32>, vector<8x8xf32>, vector<8x8xf32> -> vector<8x8xf32>
    %183 = vector.extract_strided_slice %160 {offsets = [8, 0], sizes = [8, 8], strides = [1, 1]} : vector<16x8xf32> to vector<8x8xf32>
    %184 = vector.extract_strided_slice %161 {offsets = [8, 0], sizes = [8, 8], strides = [1, 1]} : vector<16x8xf32> to vector<8x8xf32>
    %cst_50 = arith.constant dense<0.000000e+00> : vector<8x8xf32>
    %185 = tpu.matmul %183, %184, %cst_50 {dimension_numbers = #tpu.dot_dimension_numbers<[1], [1], [0], [0], [0, 0, 1, 0], [], []>} : vector<8x8xf32>, vector<8x8xf32>, vector<8x8xf32> -> vector<8x8xf32>
    %186 = vector.extract_strided_slice %13 {offsets = [8, 0], sizes = [8, 1], strides = [1, 1]} : vector<16x1xi1> to vector<8x1xi1>
    %cst_51 = arith.constant -1.76776698E+19 : f32
    %187 = vector.shape_cast %186 : vector<8x1xi1> to vector<8x1xi1>
    %188 = vector.broadcast %187 : vector<8x1xi1> to vector<8x8xi1>
    %189 = vector.broadcast %cst_51 : f32 to vector<8x8xf32>
    %190 = arith.select %188, %185, %189 : vector<8x8xi1>, vector<8x8xf32>
    %cst_52 = arith.constant dense<0xFF800000> : vector<8xf32>
    %191 = vector.multi_reduction <maximumf>, %190, %cst_52 [1] : vector<8x8xf32> to vector<8xf32>
    %192 = vector.shape_cast %191 : vector<8xf32> to vector<8x1xf32>
    %193 = vector.broadcast %192 : vector<8x1xf32> to vector<8x8xf32>
    %194 = arith.subf %190, %193 : vector<8x8xf32>
    %195 = math.exp %194 : vector<8x8xf32>
    %cst_53 = arith.constant dense<0.000000e+00> : vector<8xf32>
    %196 = vector.multi_reduction <add>, %195, %cst_53 [1] : vector<8x8xf32> to vector<8xf32>
    %197 = vector.shape_cast %196 : vector<8xf32> to vector<8x1xf32>
    %198 = tpu.reciprocal %197 {approx = true} : vector<8x1xf32> -> vector<8x1xf32>
    %199 = vector.broadcast %198 : vector<8x1xf32> to vector<8x8xf32>
    %200 = arith.mulf %195, %199 : vector<8x8xf32>
    %201 = vector.extract_strided_slice %162 {offsets = [8, 0], sizes = [8, 8], strides = [1, 1]} : vector<16x8xf32> to vector<8x8xf32>
    %cst_54 = arith.constant dense<0.000000e+00> : vector<8x8xf32>
    %202 = tpu.matmul %200, %201, %cst_54 {dimension_numbers = #tpu.dot_dimension_numbers<[1], [0], [0], [1], [0, 0, 1, 1], [], []>} : vector<8x8xf32>, vector<8x8xf32>, vector<8x8xf32> -> vector<8x8xf32>
    %203 = tpu.concatenate %182, %202 in 0 : vector<8x8xf32>, vector<8x8xf32> -> vector<16x8xf32>
    %204 = arith.truncf %203 : vector<16x8xf32> to vector<16x8xbf16>
    %205 = vector.extract_strided_slice %14 {offsets = [24, 0], sizes = [8, 32], strides = [1, 1]} : vector<32x32xbf16> to vector<8x32xbf16>
    %cst_55 = arith.constant dense<0.000000e+00> : vector<16x32xf32>
    %206 = tpu.matmul %204, %205, %cst_55 {dimension_numbers = #tpu.dot_dimension_numbers<[1], [0], [0], [1], [0, 0, 1, 1], [], []>} : vector<16x8xbf16>, vector<8x32xbf16>, vector<16x32xf32> -> vector<16x32xf32>
    %207 = arith.addf %159, %206 : vector<16x32xf32>
    %c0_56 = arith.constant 0 : index
    %c0_57 = arith.constant 0 : index
    %208 = vector.load %arg6[%c0_56, %c0_57] : memref<1x32xf32, #tpu.memory_space<vmem>>, vector<1x32xf32>
    %209 = vector.broadcast %208 : vector<1x32xf32> to vector<16x32xf32>
    %210 = arith.addf %207, %209 : vector<16x32xf32>
    %211 = arith.addf %210, %2 : vector<16x32xf32>
    %cst_58 = arith.constant dense<0.000000e+00> : vector<16xf32>
    %212 = vector.multi_reduction <add>, %211, %cst_58 [1] : vector<16x32xf32> to vector<16xf32>
    %213 = vector.shape_cast %212 : vector<16xf32> to vector<16x1xf32>
    %cst_59 = arith.constant 3.200000e+01 : f32
    %214 = vector.broadcast %cst_59 : f32 to vector<16x1xf32>
    %215 = arith.divf %213, %214 : vector<16x1xf32>
    %216 = vector.broadcast %215 : vector<16x1xf32> to vector<16x32xf32>
    %217 = arith.subf %211, %216 : vector<16x32xf32>
    %218 = arith.mulf %217, %217 : vector<16x32xf32>
    %cst_60 = arith.constant dense<0.000000e+00> : vector<16xf32>
    %219 = vector.multi_reduction <add>, %218, %cst_60 [1] : vector<16x32xf32> to vector<16xf32>
    %220 = vector.shape_cast %219 : vector<16xf32> to vector<16x1xf32>
    %cst_61 = arith.constant 3.200000e+01 : f32
    %221 = vector.broadcast %cst_61 : f32 to vector<16x1xf32>
    %222 = arith.divf %220, %221 : vector<16x1xf32>
    %223 = vector.broadcast %215 : vector<16x1xf32> to vector<16x32xf32>
    %224 = arith.subf %211, %223 : vector<16x32xf32>
    %cst_62 = arith.constant 9.99999974E-6 : f32
    %225 = vector.broadcast %cst_62 : f32 to vector<16x1xf32>
    %226 = arith.addf %222, %225 : vector<16x1xf32>
    %227 = math.rsqrt %226 : vector<16x1xf32>
    %228 = vector.broadcast %227 : vector<16x1xf32> to vector<16x32xf32>
    %229 = arith.mulf %224, %228 : vector<16x32xf32>
    %c0_63 = arith.constant 0 : index
    %c0_64 = arith.constant 0 : index
    %230 = vector.load %arg7[%c0_63, %c0_64] : memref<1x32xf32, #tpu.memory_space<vmem>>, vector<1x32xf32>
    %231 = vector.broadcast %230 : vector<1x32xf32> to vector<16x32xf32>
    %232 = arith.mulf %229, %231 : vector<16x32xf32>
    %c0_65 = arith.constant 0 : index
    %c0_66 = arith.constant 0 : index
    %233 = vector.load %arg8[%c0_65, %c0_66] : memref<1x32xf32, #tpu.memory_space<vmem>>, vector<1x32xf32>
    %234 = vector.broadcast %233 : vector<1x32xf32> to vector<16x32xf32>
    %235 = arith.addf %232, %234 : vector<16x32xf32>
    %236 = arith.truncf %235 : vector<16x32xf32> to vector<16x32xbf16>
    %c0_67 = arith.constant 0 : index
    %c0_68 = arith.constant 0 : index
    %237 = vector.load %arg9[%c0_67, %c0_68] : memref<32x64xbf16, #tpu.memory_space<vmem>>, vector<32x64xbf16>
    %cst_69 = arith.constant dense<0.000000e+00> : vector<16x64xf32>
    %238 = tpu.matmul %236, %237, %cst_69 {dimension_numbers = #tpu.dot_dimension_numbers<[1], [0], [0], [1], [0, 0, 1, 1], [], []>} : vector<16x32xbf16>, vector<32x64xbf16>, vector<16x64xf32> -> vector<16x64xf32>
    %c0_70 = arith.constant 0 : index
    %c0_71 = arith.constant 0 : index
    %239 = vector.load %arg10[%c0_70, %c0_71] : memref<1x64xf32, #tpu.memory_space<vmem>>, vector<1x64xf32>
    %240 = vector.broadcast %239 : vector<1x64xf32> to vector<16x64xf32>
    %241 = arith.addf %238, %240 : vector<16x64xf32>
    %cst_72 = arith.constant 0.000000e+00 : f32
    %242 = vector.broadcast %cst_72 : f32 to vector<16x64xf32>
    %243 = arith.maximumf %241, %242 : vector<16x64xf32>
    %244 = arith.truncf %243 : vector<16x64xf32> to vector<16x64xbf16>
    %c0_73 = arith.constant 0 : index
    %c0_74 = arith.constant 0 : index
    %245 = vector.load %arg11[%c0_73, %c0_74] : memref<64x32xbf16, #tpu.memory_space<vmem>>, vector<64x32xbf16>
    %cst_75 = arith.constant dense<0.000000e+00> : vector<16x32xf32>
    %246 = tpu.matmul %244, %245, %cst_75 {dimension_numbers = #tpu.dot_dimension_numbers<[1], [0], [0], [1], [0, 0, 1, 1], [], []>} : vector<16x64xbf16>, vector<64x32xbf16>, vector<16x32xf32> -> vector<16x32xf32>
    %c0_76 = arith.constant 0 : index
    %c0_77 = arith.constant 0 : index
    %247 = vector.load %arg12[%c0_76, %c0_77] : memref<1x32xf32, #tpu.memory_space<vmem>>, vector<1x32xf32>
    %248 = vector.broadcast %247 : vector<1x32xf32> to vector<16x32xf32>
    %249 = arith.addf %246, %248 : vector<16x32xf32>
    %250 = arith.addf %249, %235 : vector<16x32xf32>
    %cst_78 = arith.constant dense<0.000000e+00> : vector<16xf32>
    %251 = vector.multi_reduction <add>, %250, %cst_78 [1] : vector<16x32xf32> to vector<16xf32>
    %252 = vector.shape_cast %251 : vector<16xf32> to vector<16x1xf32>
    %cst_79 = arith.constant 3.200000e+01 : f32
    %253 = vector.broadcast %cst_79 : f32 to vector<16x1xf32>
    %254 = arith.divf %252, %253 : vector<16x1xf32>
    %255 = vector.broadcast %254 : vector<16x1xf32> to vector<16x32xf32>
    %256 = arith.subf %250, %255 : vector<16x32xf32>
    %257 = arith.mulf %256, %256 : vector<16x32xf32>
    %cst_80 = arith.constant dense<0.000000e+00> : vector<16xf32>
    %258 = vector.multi_reduction <add>, %257, %cst_80 [1] : vector<16x32xf32> to vector<16xf32>
    %259 = vector.shape_cast %258 : vector<16xf32> to vector<16x1xf32>
    %cst_81 = arith.constant 3.200000e+01 : f32
    %260 = vector.broadcast %cst_81 : f32 to vector<16x1xf32>
    %261 = arith.divf %259, %260 : vector<16x1xf32>
    %262 = vector.broadcast %254 : vector<16x1xf32> to vector<16x32xf32>
    %263 = arith.subf %250, %262 : vector<16x32xf32>
    %cst_82 = arith.constant 9.99999974E-6 : f32
    %264 = vector.broadcast %cst_82 : f32 to vector<16x1xf32>
    %265 = arith.addf %261, %264 : vector<16x1xf32>
    %266 = math.rsqrt %265 : vector<16x1xf32>
    %267 = vector.broadcast %266 : vector<16x1xf32> to vector<16x32xf32>
    %268 = arith.mulf %263, %267 : vector<16x32xf32>
    %c0_83 = arith.constant 0 : index
    %c0_84 = arith.constant 0 : index
    %269 = vector.load %arg13[%c0_83, %c0_84] : memref<1x32xf32, #tpu.memory_space<vmem>>, vector<1x32xf32>
    %270 = vector.broadcast %269 : vector<1x32xf32> to vector<16x32xf32>
    %271 = arith.mulf %268, %270 : vector<16x32xf32>
    %c0_85 = arith.constant 0 : index
    %c0_86 = arith.constant 0 : index
    %272 = vector.load %arg14[%c0_85, %c0_86] : memref<1x32xf32, #tpu.memory_space<vmem>>, vector<1x32xf32>
    %273 = vector.broadcast %272 : vector<1x32xf32> to vector<16x32xf32>
    %274 = arith.addf %271, %273 : vector<16x32xf32>
    %275 = arith.truncf %274 : vector<16x32xf32> to vector<16x32xbf16>
    %c0_87 = arith.constant 0 : index
    %c0_88 = arith.constant 0 : index
    %c0_89 = arith.constant 0 : index
    %276 = vector.load %arg15[%c0_87, %c0_88, %c0_89] : memref<1x16x32xbf16, #tpu.memory_space<vmem>>, vector<1x16x32xbf16>
    %277 = vector.shape_cast %276 : vector<1x16x32xbf16> to vector<16x32xbf16>
    %278 = vector.shape_cast %275 : vector<16x32xbf16> to vector<1x16x32xbf16>
    tpu.vector_store %arg15[%c0_87, %c0_88, %c0_89], %278 {strides = array<i32>} : memref<1x16x32xbf16, #tpu.memory_space<vmem>>, vector<1x16x32xbf16>,
    return
  }
  func.func @transform_0(%arg0: i32, %arg1: i32) -> (i32, i32, i32) {
    %c0_i32 = arith.constant 0 : i32
    %c0_i32_0 = arith.constant 0 : i32
    return %arg0, %arg1, %c0_i32 : i32, i32, i32
  }
  func.func @transform_1(%arg0: i32, %arg1: i32) -> (i32, i32, i32) {
    %c0_i32 = arith.constant 0 : i32
    %c0_i32_0 = arith.constant 0 : i32
    return %arg0, %arg1, %c0_i32 : i32, i32, i32
  }
  func.func @transform_2(%arg0: i32, %arg1: i32) -> (i32, i32) {
    %c0_i32 = arith.constant 0 : i32
    %c0_i32_0 = arith.constant 0 : i32
    %c0_i32_1 = arith.constant 0 : i32
    return %c0_i32, %c0_i32_0 : i32, i32
  }
  func.func @transform_3(%arg0: i32, %arg1: i32) -> (i32, i32) {
    %c0_i32 = arith.constant 0 : i32
    %c0_i32_0 = arith.constant 0 : i32
    %c0_i32_1 = arith.constant 0 : i32
    return %c0_i32, %c0_i32_0 : i32, i32
  }
  func.func @transform_4(%arg0: i32, %arg1: i32) -> (i32, i32) {
    %c0_i32 = arith.constant 0 : i32
    %c0_i32_0 = arith.constant 0 : i32
    %c0_i32_1 = arith.constant 0 : i32
    return %c0_i32, %c0_i32_0 : i32, i32
  }
  func.func @transform_5(%arg0: i32, %arg1: i32) -> (i32, i32) {
    %c0_i32 = arith.constant 0 : i32
    %c0_i32_0 = arith.constant 0 : i32
    %c0_i32_1 = arith.constant 0 : i32
    return %c0_i32, %c0_i32_0 : i32, i32
  }
  func.func @transform_6(%arg0: i32, %arg1: i32) -> (i32, i32) {
    %c0_i32 = arith.constant 0 : i32
    %c0_i32_0 = arith.constant 0 : i32
    %c0_i32_1 = arith.constant 0 : i32
    return %c0_i32, %c0_i32_0 : i32, i32
  }
  func.func @transform_7(%arg0: i32, %arg1: i32) -> (i32, i32) {
    %c0_i32 = arith.constant 0 : i32
    %c0_i32_0 = arith.constant 0 : i32
    %c0_i32_1 = arith.constant 0 : i32
    return %c0_i32, %c0_i32_0 : i32, i32
  }
  func.func @transform_8(%arg0: i32, %arg1: i32) -> (i32, i32) {
    %c0_i32 = arith.constant 0 : i32
    %c0_i32_0 = arith.constant 0 : i32
    %c0_i32_1 = arith.constant 0 : i32
    return %c0_i32, %c0_i32_0 : i32, i32
  }
  func.func @transform_9(%arg0: i32, %arg1: i32) -> (i32, i32) {
    %c0_i32 = arith.constant 0 : i32
    %c0_i32_0 = arith.constant 0 : i32
    %c0_i32_1 = arith.constant 0 : i32
    return %c0_i32, %c0_i32_0 : i32, i32
  }
  func.func @transform_10(%arg0: i32, %arg1: i32) -> (i32, i32) {
    %c0_i32 = arith.constant 0 : i32
    %c0_i32_0 = arith.constant 0 : i32
    %c0_i32_1 = arith.constant 0 : i32
    return %c0_i32, %c0_i32_0 : i32, i32
  }
  func.func @transform_11(%arg0: i32, %arg1: i32) -> (i32, i32) {
    %c0_i32 = arith.constant 0 : i32
    %c0_i32_0 = arith.constant 0 : i32
    %c0_i32_1 = arith.constant 0 : i32
    return %c0_i32, %c0_i32_0 : i32, i32
  }
  func.func @transform_12(%arg0: i32, %arg1: i32) -> (i32, i32) {
    %c0_i32 = arith.constant 0 : i32
    %c0_i32_0 = arith.constant 0 : i32
    %c0_i32_1 = arith.constant 0 : i32
    return %c0_i32, %c0_i32_0 : i32, i32
  }
  func.func @transform_13(%arg0: i32, %arg1: i32) -> (i32, i32, i32) {
    %c0_i32 = arith.constant 0 : i32
    %c0_i32_0 = arith.constant 0 : i32
    return %arg0, %arg1, %c0_i32 : i32, i32, i32
  }
}

</mosaic_0001>

<bundles_post_ra>
// kernel: transformer_forward.4
= control target key start
LH: loop header
LB: loop body
LE: loop exit
PB: predicated region body
PF: predicated region fallthrough
CT: control target
= control target key end

     0   :  { %vm41_vm0 = vcmask 130048   ;;  %vm71_vm1 = vcmask 257024   ;;  %s143_s1 = inlined_call_operand.vmem [shape: bf16[16,32], index: 1, kind: input, shape index: {}]   ;;  %s144_s0 = inlined_call_operand.vmem [shape: bf16[32,16], index: 0, kind: input, shape index: {}]   ;;  %s145_s2 = inlined_call_operand.vmem [shape: f32[1,32], index: 2, kind: input, shape index: {}]   ;;  %s146_s3 = inlined_call_operand.vmem [shape: bf16[32,32], index: 3, kind: output, shape index: {}]  }
   0x1   :  { %v96_v0 = vld [vmem:[%s143_s1] sm:$0xff]  ;;  %v95_v2 = vld [vmem:[%s144_s0 + $0x8] sm:$0xff] }
   0x2   :  { %v94_v1 = vld [vmem:[%s144_s0] sm:$0xff]  ;;  %55 = vmatpush.bf16.msra.mxu0 %v96_v0  ;;  %97 = vmatpush.bf16.msra.mxu1 %v96_v0 }
   0x3   :  { %v98_v3 = vld [vmem:[%s145_s2] ss:$0 sm:$0xff] }
   0x5   :  { %92 = vmatmul.msk.bf16.vlgmr.msra.gmra.mxu0 %vm41_vm0, %v94_v1  ;;  %93 = vmatmul.msk.bf16.vlgmr.msra.gmra.mxu1 %vm41_vm0, %v95_v2 }
  0x82   :  { %v57_v4 = vpop.f32.mrf.mxu0  ;;  %v62_v5 = vpop.f32.mrf.mxu1 }
  0x83   :  { %v58_v6 = vadd.f32 %v98_v3, %v57_v4  ;;  %v63_v7 = vadd.f32 %v98_v3, %v62_v5 }
  0x85   :  { %v67_v8 = vpack.c.bf16 %v58_v6, %v58_v6  ;;  %v69_v9 = vpack.c.bf16 %v63_v7, %v63_v7 }
  0x87   :  { %72 = vst.msk [vmem:[%s146_s3] sm:$0xf] %vm71_vm1, %v67_v8 }
  0x88   :  { %74 = vst.msk [vmem:[%s146_s3 + $0x8] sm:$0xf] %vm71_vm1, %v69_v9 }
  0x8a   :  { %v59_v10 = vpop.f32.mrf.mxu0  ;;  %v64_v11 = vpop.f32.mrf.mxu1 }
  0x8b   :  { %v60_v12 = vadd.f32 %v98_v3, %v59_v10  ;;  %v65_v13 = vadd.f32 %v98_v3, %v64_v11 }
  0x8d   :  { %v68_v14 = vpack.c.bf16 %v60_v12, %v60_v12  ;;  %v70_v15 = vpack.c.bf16 %v65_v13, %v65_v13 }
  0x8f   :  { %73 = vst.msk [vmem:[%s146_s3 + $0x4] sm:$0xf] %vm71_vm1, %v68_v14 }
  0x90   :  { %75 = vst.msk [vmem:[%s146_s3 + $0xc] sm:$0xf] %vm71_vm1, %v70_v15 }

// kernel: transformer_forward.7
= control target key start
LH: loop header
LB: loop body
LE: loop exit
PB: predicated region body
PF: predicated region fallthrough
CT: control target
= control target key end

     0   :  { %vm49_vm0 = vcmask 261120   ;;  %s155_s1 = inlined_call_operand.vmem [shape: bf16[32,128], index: 1, kind: input, shape index: {}]   ;;  %s156_s2 = inlined_call_operand.vmem [shape: f32[1,128], index: 2, kind: input, shape index: {}]   ;;  %s157_s0 = inlined_call_operand.vmem [shape: bf16[32,32], index: 0, kind: input, shape index: {}]   ;;  %s158_s3 = inlined_call_operand.vmem [shape: f32[32,128], index: 3, kind: output, shape index: {}]  }
   0x1   :  { %v104_v0 = vld [vmem:[%s155_s1 + $0x8] sm:$0xff]  ;;  %v103_v1 = vld [vmem:[%s155_s1] sm:$0xff] }
   0x2   :  { %62 = vmatpush.bf16.msra.mxu0 %v104_v0  ;;  %105 = vmatpush.bf16.msra.mxu1 %v104_v0  ;;  %v101_v2 = vld [vmem:[%s157_s0] sm:$0xff]  ;;  %v102_v3 = vld [vmem:[%s157_s0 + $0x8] sm:$0xff] }
   0x3   :  { %v107_v4 = vld [vmem:[%s156_s2] ss:$0 sm:$0xff] }
   0x6   :  { %63 = vmatpush.bf16.msra.mxu0 %v103_v1  ;;  %106 = vmatpush.bf16.msra.mxu1 %v103_v1 }
   0x9   :  { %99 = vmatmul.msk.bf16.vlgmr.msra.gmra.mxu0 %vm49_vm0, %v101_v2  ;;  %100 = vmatmul.msk.bf16.vlgmr.msra.gmra.mxu1 %vm49_vm0, %v102_v3 }
  0x86   :  { %v65_v5 = vpop.f32.mrf.mxu0  ;;  %v70_v6 = vpop.f32.mrf.mxu1 }
  0x87   :  { %v66_v7 = vadd.f32 %v107_v4, %v65_v5  ;;  %v71_v8 = vadd.f32 %v107_v4, %v70_v6 }
  0x89   :  { %75 = vst [vmem:[%s158_s3] sm:$0xff] %v66_v7 }
  0x8a   :  { %77 = vst [vmem:[%s158_s3 + $0x10] sm:$0xff] %v71_v8 }
  0x8e   :  { %v67_v9 = vpop.f32.mrf.mxu0  ;;  %v72_v10 = vpop.f32.mrf.mxu1 }
  0x8f   :  { %v68_v11 = vadd.f32 %v107_v4, %v67_v9  ;;  %v73_v12 = vadd.f32 %v107_v4, %v72_v10 }
  0x91   :  { %76 = vst [vmem:[%s158_s3 + $0x8] sm:$0xff] %v68_v11 }
  0x92   :  { %78 = vst [vmem:[%s158_s3 + $0x18] sm:$0xff] %v73_v12 }

// kernel: transformer_forward.5
= control target key start
LH: loop header
LB: loop body
LE: loop exit
PB: predicated region body
PF: predicated region fallthrough
CT: control target
= control target key end

     0   :  { %s1819_s25 = smov 0   ;;  %s1821_s26 = smov 0   ;;  %s2066_s0 = inlined_call_operand.vmem [shape: bf16[2,16,32], index: 0, kind: input, shape index: {}]   ;;  %s2067_s1 = inlined_call_operand.vmem [shape: f32[2,16,1], index: 1, kind: input, shape index: {}]   ;;  %s2068_s2 = inlined_call_operand.vmem [shape: bf16[32,96], index: 2, kind: input, shape index: {}]   ;;  %s2069_s3 = inlined_call_operand.vmem [shape: bf16[32,32], index: 3, kind: input, shape index: {}]   ;;  %s2070_s4 = inlined_call_operand.vmem [shape: f32[1,32], index: 4, kind: input, shape index: {}]   ;;  %s2071_s5 = inlined_call_operand.vmem [shape: f32[1,32], index: 5, kind: input, shape index: {}]   ;;  %s2072_s6 = inlined_call_operand.vmem [shape: f32[1,32], index: 6, kind: input, shape index: {}]   ;;  %s2073_s7 = inlined_call_operand.vmem [shape: bf16[32,64], index: 7, kind: input, shape index: {}]   ;;  %s2074_s8 = inlined_call_operand.vmem [shape: f32[1,64], index: 8, kind: input, shape index: {}]   ;;  %s2075_s9 = inlined_call_operand.vmem [shape: bf16[64,32], index: 9, kind: input, shape index: {}]   ;;  %s2076_s10 = inlined_call_operand.vmem [shape: f32[1,32], index: 10, kind: input, shape index: {}]   ;;  %s2077_s11 = inlined_call_operand.vmem [shape: f32[1,32], index: 11, kind: input, shape index: {}]   ;;  %s2078_s12 = inlined_call_operand.vmem [shape: f32[1,32], index: 12, kind: input, shape index: {}]   ;;  %s2079_s13 = inlined_call_operand.vmem [shape: bf16[2,16,32], index: 13, kind: output, shape index: {}]  }
   0x1   :  { %s1823_s27 = smov 0  }
   0x2 LB: > { %s35_s28 = sadd.s32 1, %s1730_s26  ;;  %p1536_p0 = scmp.ge.s32.totalorder %s1734_s27, 1  ;;  %s1734_s27 = sphi %s1823_s27, %s23_s27   ;;  %s1730_s26 = sphi %s1821_s26, %s2081_s26   ;;  %s1726_s25 = sphi %s1819_s25, %s2080_s25  }
   0x3   : > { %p37_p1 = scmp.ge.s32.totalorder %s35_s28, 2  ;;  %p425_p2 = scmp.lt.s32.totalorder %s1734_s27, 3 }
   0x5   : > { %s2083_s28 = smov (%p37_p1, %s35_s28), 0  ;;  %p426_p3 = pnand %p1536_p0, %p425_p2 }
   0x6   : > { %p487_p4 = scmp.lt.s32.totalorder (!%p426_p3), %s1726_s25, 1  ;;  %s1736_s20 = smov (!%p426_p3), 96  }
   0x7   : > { %429 = sbr.rel (%p426_p3) target bundleno = 2558 (0x9fe), region = 72  ;;  %s1738_s29 = smov (!%p426_p3), 64  }
   0x8   : > { %s1739_s30 = smov (!%p426_p3), 88   ;;  %s1740_s14 = smov (!%p426_p3), 120  }
   0x9   : > { %s1741_s15 = smov (!%p426_p3), 80   ;;  %s1742_s17 = smov (!%p426_p3), 112  }
   0xa   : > { %s1744_s22 = smov (!%p426_p3), 48   ;;  %s1745_s23 = smov (!%p426_p3), 104  }
   0xc   : > { %v1617_v0 = vld [vmem:[%s2068_s2 + $0x8] sm:$0xff]  ;;  %v1616_v1 = vld [vmem:[%s2068_s2] sm:$0xff]  ;;  %s2085_s25 = smov (!%p487_p4, %s1726_s25), 1  ;;  %vm542_vm0 = vcmask 261120   ;;  %v1737_v6 = vmov 0   ;;  %vm573_vm3 = vcmask 64512  }
   0xd   : > { %552 = vmatpush.bf16.msra.mxu0 %v1617_v0  ;;  %s1612_s16 = sshll.u32 %s2085_s25, 3  ;;  %s1613_s21 = sshll.u32 %s2085_s25, 4  ;;  %1661 = vset.pattern.permute.xlu1 %v1737_v6  ;;  %v566_v46 = vld [vmem:[%s2069_s3] sm:$0xf]  ;;  %vm850_vm6 = vcmask 1043456   ;;  %vm1346_vm14 = vcmask 523264  }
   0xe   : > { %s1851_s19 = scalar_lea.vmem %s2066_s0, %s1612_s16  ;;  %s504_s24 = scalar_lea.vmem %s2067_s1, %s1613_s21  ;;  %1662 = vset.pattern.permute.xlu0 %v1737_v6  ;;  %v872_v47 = vsel %vm850_vm6, %v566_v46, 0 }
   0xf   : > { %v1615_v2 = vld [vmem:[%s1851_s19] sm:$0xff]  ;;  %v563_v8 = vld [vmem:[%s504_s24 + $0x8] sm:$0xff]  ;;  %s1743_s21 = smov 56  }
  0x10   : > { %v562_v5 = vld [vmem:[%s504_s24] sm:$0xff]  ;;  %vm565_vm2 = vcmp.gt.f32.partialorder %v563_v8, 0.0  ;;  %s1746_s24 = smov 72  }
  0x11   : > { %553 = vmatpush.bf16.msra.mxu0 %v1616_v1  ;;  %vm564_vm1 = vcmp.gt.f32.partialorder %v562_v5, 0.0  ;;  %v670_v9 = vsel %vm565_vm2, 1, %v1737_v6 }
  0x12   : > { %v599_v7 = vsel %vm564_vm1, 1, %v1737_v6 }
  0x13   : > { %601 = vperm.xlu1 %1661, %v599_v7  }
  0x14   : > { %1555 = vmatmul.msk.bf16.vlgmr.msra.gmra.mxu0 %vm542_vm0, %v1615_v2 }
  0x1b   : > { %672 = vperm.xlu1 %1661, %v670_v9  }
  0x85   : > { %v1877_v14 = vpop.permute.xlu1 %601 }
  0x86   : > { %vm603_vm4 = vcmp.eq.s32.totalorder %v1877_v14, 1 }
  0x8d   : > { %v1883_v18 = vpop.permute.xlu1 %672 }
  0x8e   : > { %vm674_vm5 = vcmp.eq.s32.totalorder %v1883_v18, 1 }
  0x91   : > { %v1855_v3 = vpop.f32.mrf.mxu0 }
  0x92   : > { %571 = vrot.lane.b32.xlu0 %v1855_v3, %s1736_s20  ;;  %v1867_v11 = vmul.f32 0.17677669, %v1855_v3 }
  0x99   : > { %v1858_v4 = vpop.f32.mrf.mxu0 }
  0x9a   : > { %643 = vrot.lane.b32.xlu0 %v1858_v4, %s1736_s20  ;;  %v1873_v13 = vmul.f32 0.17677669, %v1858_v4 }
 0x104   : > { %v572_v10 = vpop.permute.xlu0 %571 }
 0x105   : > { %1556 = vmatpush.xpose.msk.msrb.mxu0 %vm573_vm3, %v572_v10 }
 0x108   : > { %1557 = vmatmul.msk.f32.vlgmr.msrb.gmra.mxu0 %vm573_vm3, %v1867_v11 }
 0x109   : > { %881 = vmatpush.bf16.msra.mxu0 %v872_v47 }
 0x10c   : > { %v644_v12 = vpop.permute.xlu0 %643 }
 0x10d   : > { %1559 = vmatpush.xpose.msk.msra.mxu3 %vm573_vm3, %v644_v12 }
 0x110   : > { %1560 = vmatmul.msk.f32.vlgmr.msra.gmra.mxu3 %vm573_vm3, %v1873_v13 }
 0x185   : > { %v596_v15 = vpop.f32.mrf.mxu0 }
 0x186   : > { %v604_v16 = vsel %vm603_vm4, %v596_v15, -1.767767e+19 }
 0x187   : > { %v605_v17 = vsel %vm573_vm3, %v604_v16, -inf }
 0x188   : > { %606 = vmax.xlane.f32.xlu2 %v605_v17 }
 0x193   : > { %v667_v19 = vpop.f32.mrf.mxu3 }
 0x194   : > { %v675_v20 = vsel %vm674_vm5, %v667_v19, -1.767767e+19 }
 0x195   : > { %v676_v21 = vsel %vm573_vm3, %v675_v20, -inf }
 0x196   : > { %677 = vmax.xlane.f32.xlu2 %v676_v21 }
 0x1ae   : > { %616 = vrot.lane.b32.xlu2 %v1855_v3, %s1738_s29 }
 0x1b6   : > { %687 = vrot.lane.b32.xlu2 %v1858_v4, %s1738_s29  ;;  %s1747_s29 = smov 40  }
 0x1be   : > { %782 = vrot.lane.b32.xlu2 %v1858_v4, %s1739_s30 }
 0x1c6   : > { %780 = vrot.lane.b32.xlu2 %v1873_v13, %s1740_s14 }
 0x1ce   : > { %956 = vrot.lane.b32.xlu2 %v1858_v4, %s1741_s15 }
 0x1d6   : > { %954 = vrot.lane.b32.xlu2 %v1873_v13, %s1742_s17 }
 0x1fb   : > { %v607_v22 = vpop.xlane.xlu2 %606 }
 0x1fc   : > { %v608_v23 = vsub.f32 %v604_v16, %v607_v22 }
 0x1fe   : > { %v609_v24 = vmul.f32 1.442695, %v608_v23 }
 0x200   : > { %1670 = vpow2.f32 %v609_v24 }
 0x206   : > { %v1671_v25 = vpop.eup %1670 }
 0x207   : > { %v611_v26 = vsel %vm573_vm3, %v1671_v25, 0.0 }
 0x208   : > { %612 = vadd.xlane.f32.xlu0 %v611_v26 }
 0x209   : > { %v678_v27 = vpop.xlane.xlu2 %677 }
 0x20a   : > { %v679_v28 = vsub.f32 %v675_v20, %v678_v27 }
 0x20c   : > { %v680_v29 = vmul.f32 1.442695, %v679_v28 }
 0x20e   : > { %1672 = vpow2.f32 %v680_v29 }
 0x211   : > { %v617_v30 = vpop.permute.xlu2 %616 }
 0x212   : > { %637 = vmatpush.msra.mxu2 %v617_v30 }
 0x214   : > { %v1673_v31 = vpop.eup %1672 }
 0x215   : > { %v682_v32 = vsel %vm573_vm3, %v1673_v31, 0.0 }
 0x216   : > { %683 = vadd.xlane.f32.xlu1 %v682_v32 }
 0x219   : > { %v688_v33 = vpop.permute.xlu2 %687 }
 0x21a   : > { %708 = vmatpush.msrb.mxu2 %v688_v33 }
 0x21c   : > { %890 = vrot.lane.b32.xlu0 %v1855_v3, %s1741_s15 }
 0x221   : > { %v783_v37 = vpop.permute.xlu2 %782 }
 0x229   : > { %v781_v40 = vpop.permute.xlu2 %780 }
 0x22f   : > { %888 = vrot.lane.b32.xlu1 %v1867_v11, %s1742_s17 }
 0x231   : > { %v957_v43 = vpop.permute.xlu2 %956 }
 0x239   : > { %v955_v45 = vpop.permute.xlu2 %954 }
 0x27b   : > { %v613_v34 = vpop.xlane.xlu0 %612 }
 0x27c   : > { %1674 = vrcp.f32 %v613_v34 }
 0x282   : > { %v1675_v35 = vpop.eup %1674 }
 0x283   : > { %v615_v36 = vmul.f32 %v1675_v35, %v1671_v25 }
 0x285   : > { %1558 = vmatmul.msk.f32.vlgmr.msra.gmra.mxu2 %vm573_vm3, %v615_v36 }
 0x286   : > { %1565 = vmatpush.xpose.msk.msra.mxu2 %vm573_vm3, %v783_v37 }
 0x289   : > { %v684_v38 = vpop.xlane.xlu1 %683 }
 0x28a   : > { %1676 = vrcp.f32 %v684_v38 }
 0x28e   : > { %v891_v42 = vpop.permute.xlu0 %890 }
 0x290   : > { %v1677_v39 = vpop.eup %1676 }
 0x291   : > { %v686_v41 = vmul.f32 %v1677_v39, %v1673_v31 }
 0x293   : > { %1561 = vmatmul.msk.f32.vlgmr.msrb.gmra.mxu2 %vm573_vm3, %v686_v41 }
 0x294   : > { %1570 = vmatpush.xpose.msk.msrb.mxu2 %vm573_vm3, %v891_v42 }
 0x29b   : > { %1566 = vmatmul.msk.f32.vlgmr.msra.gmra.mxu2 %vm573_vm3, %v781_v40 }
 0x29c   : > { %1573 = vmatpush.xpose.msk.msra.mxu2 %vm573_vm3, %v957_v43 }
 0x2a1   : > { %v889_v44 = vpop.permute.xlu1 %888 }
 0x2a3   : > { %1571 = vmatmul.msk.f32.vlgmr.msrb.gmra.mxu2 %vm573_vm3, %v889_v44 }
 0x2ab   : > { %1574 = vmatmul.msk.f32.vlgmr.msra.gmra.mxu2 %vm573_vm3, %v955_v45 }
 0x308   : > { %v639_v48 = vpop.f32.mrf.mxu2 }
 0x316   : > { %v710_v49 = vpop.f32.mrf.mxu2 }
 0x317   : > { %v713_v50 = vpack.c.bf16 %v710_v49, %v639_v48 }
 0x319   : > { %1569 = vmatmul.msk.bf16.vlgmr.msra.gmra.mxu0 %vm573_vm3, %v713_v50 }
 0x31e   : > { %v805_v51 = vpop.f32.mrf.mxu2 }
 0x31f   : > { %v808_v52 = vsel %vm674_vm5, %v805_v51, -1.767767e+19 }
 0x320   : > { %v809_v53 = vsel %vm573_vm3, %v808_v52, -inf }
 0x321   : > { %810 = vmax.xlane.f32.xlu0 %v809_v53 }
 0x326   : > { %v913_v54 = vpop.f32.mrf.mxu2 }
 0x327   : > { %v916_v55 = vsel %vm603_vm4, %v913_v54, -1.767767e+19 }
 0x328   : > { %v917_v56 = vsel %vm573_vm3, %v916_v55, -inf }
 0x329   : > { %918 = vmax.xlane.f32.xlu2 %v917_v56 }
 0x32e   : > { %v979_v57 = vpop.f32.mrf.mxu2 }
 0x32f   : > { %v982_v58 = vsel %vm674_vm5, %v979_v57, -1.767767e+19 }
 0x330   : > { %v983_v59 = vsel %vm573_vm3, %v982_v58, -inf }
 0x331   : > { %984 = vmax.xlane.f32.xlu1 %v983_v59 }
 0x335   : > { %716 = vrot.lane.b32.xlu0 %v1855_v3, %s1739_s30 }
 0x341   : > { %820 = vrot.lane.b32.xlu2 %v1858_v4, %s1743_s21 }
 0x34a   : > { %714 = vrot.lane.b32.xlu1 %v1867_v11, %s1740_s14 }
 0x352   : > { %928 = vrot.lane.b32.xlu1 %v1855_v3, %s1744_s22 }
 0x35a   : > { %994 = vrot.lane.b32.xlu1 %v1858_v4, %s1744_s22 }
 0x362   : > { %1043 = vrot.lane.b32.xlu1 %v1867_v11, %s1745_s23 }
 0x36a   : > { %1109 = vrot.lane.b32.xlu1 %v1873_v13, %s1745_s23 }
 0x394   : > { %v811_v60 = vpop.xlane.xlu0 %810 }
 0x395   : > { %v812_v61 = vsub.f32 %v808_v52, %v811_v60 }
 0x396   : > { %v1950_v36 = vpop.f32.mrf.mxu0 }
 0x397   : > { %v813_v62 = vmul.f32 1.442695, %v812_v61 }
 0x399   : > { %1678 = vpow2.f32 %v813_v62 }
 0x39c   : > { %v919_v63 = vpop.xlane.xlu2 %918 }
 0x39d   : > { %v920_v0 = vsub.f32 %v916_v55, %v919_v63 }
 0x39e   : > { %v1954_v38 = vpop.f32.mrf.mxu0 }
 0x39f   : > { %v1679_v1 = vpop.eup %1678  ;;  %v921_v2 = vmul.f32 1.442695, %v920_v0 }
 0x3a0   : > { %v815_v5 = vsel %vm573_vm3, %v1679_v1, 0.0 }
 0x3a1   : > { %1680 = vpow2.f32 %v921_v2  ;;  %816 = vadd.xlane.f32.xlu2 %v815_v5 }
 0x3a4   : > { %v985_v6 = vpop.xlane.xlu1 %984  ;;  %v821_v11 = vpop.permute.xlu2 %820 }
 0x3a5   : > { %v986_v7 = vsub.f32 %v982_v58, %v985_v6  ;;  %v567_v6 = vld [vmem:[%s2069_s3 + $0x4] sm:$0xf] }
 0x3a7   : > { %v1681_v8 = vpop.eup %1680  ;;  %v987_v9 = vmul.f32 1.442695, %v986_v7  ;;  %v717_v10 = vpop.permute.xlu0 %716  ;;  %v852_v7 = vsel %vm850_vm6, %v567_v6, 0 }
 0x3a8   : > { %1562 = vmatpush.xpose.msk.msra.mxu1 %vm573_vm3, %v717_v10  ;;  %v923_v12 = vsel %vm573_vm3, %v1681_v8, 0.0 }
 0x3a9   : > { %1682 = vpow2.f32 %v987_v9  ;;  %924 = vadd.xlane.f32.xlu2 %v923_v12  ;;  %v568_v9 = vld [vmem:[%s2069_s3 + $0x8] sm:$0xf] }
 0x3ac   : > { %841 = vmatpush.msrb.mxu1 %v821_v11 }
 0x3af   : > { %v1683_v13 = vpop.eup %1682 }
 0x3b0   : > { %v989_v15 = vsel %vm573_vm3, %v1683_v13, 0.0 }
 0x3b1   : > { %990 = vadd.xlane.f32.xlu0 %v989_v15 }
 0x3bc   : > { %v715_v16 = vpop.permute.xlu1 %714 }
 0x3bd   : > { %1563 = vmatmul.msk.f32.vlgmr.msra.gmra.mxu1 %vm573_vm3, %v715_v16  ;;  %v569_v16 = vld [vmem:[%s2069_s3 + $0xc] sm:$0xf] }
 0x3c1   : > { %1045 = vrot.lane.b32.xlu2 %v1855_v3, %s1746_s24 }
 0x3c4   : > { %v929_v17 = vpop.permute.xlu1 %928 }
 0x3c5   : > { %949 = vmatpush.msra.mxu1 %v929_v17  ;;  %v1180_v17 = vsel %vm850_vm6, %v569_v16, 0  ;;  %v1664_v16 = vld [vmem:[%s2071_s5] ss:$0 sm:$0xff] }
 0x3c9   : > { %1111 = vrot.lane.b32.xlu2 %v1858_v4, %s1746_s24  ;;  %s514_s24 = scalar_lea.vmem %s2079_s13, %s1612_s16 }
 0x3cc   : > { %v995_v23 = vpop.permute.xlu1 %994 }
 0x3d4   : > { %v1044_v28 = vpop.permute.xlu1 %1043 }
 0x3dc   : > { %v1110_v32 = vpop.permute.xlu1 %1109 }
 0x414   : > { %v817_v19 = vpop.xlane.xlu2 %816 }
 0x415   : > { %1684 = vrcp.f32 %v817_v19 }
 0x41b   : > { %v1685_v20 = vpop.eup %1684 }
 0x41c   : > { %v925_v21 = vpop.xlane.xlu2 %924  ;;  %v819_v22 = vmul.f32 %v1685_v20, %v1679_v1 }
 0x41d   : > { %1686 = vrcp.f32 %v925_v21 }
 0x41e   : > { %1567 = vmatmul.msk.f32.vlgmr.msrb.gmra.mxu1 %vm573_vm3, %v819_v22 }
 0x41f   : > { %1015 = vmatpush.msrb.mxu1 %v995_v23 }
 0x423   : > { %v1687_v24 = vpop.eup %1686 }
 0x424   : > { %v927_v25 = vmul.f32 %v1687_v24, %v1681_v8  ;;  %v991_v26 = vpop.xlane.xlu0 %990  ;;  %v1046_v27 = vpop.permute.xlu2 %1045 }
 0x425   : > { %1688 = vrcp.f32 %v991_v26  ;;  %1577 = vmatpush.xpose.msk.msrb.mxu0 %vm573_vm3, %v1046_v27  ;;  %v517_v26 = vld [vmem:[%s1851_s19] sm:$0xff]  }
 0x426   : > { %1572 = vmatmul.msk.f32.vlgmr.msra.gmra.mxu1 %vm573_vm3, %v927_v25 }
 0x428   : > { %1578 = vmatmul.msk.f32.vlgmr.msrb.gmra.mxu0 %vm573_vm3, %v1044_v28  ;;  %v1663_v28 = vld [vmem:[%s2070_s4] ss:$0 sm:$0xff] }
 0x42b   : > { %v1689_v29 = vpop.eup %1688 }
 0x42c   : > { %v993_v30 = vmul.f32 %v1689_v29, %v1683_v13  ;;  %v1112_v31 = vpop.permute.xlu2 %1111 }
 0x42d   : > { %1580 = vmatpush.xpose.msk.msra.mxu1 %vm573_vm3, %v1112_v31  ;;  %v519_v31 = vunpack.c.l.bf16 %v517_v26 }
 0x42e   : > { %1575 = vmatmul.msk.f32.vlgmr.msrb.gmra.mxu1 %vm573_vm3, %v993_v30 }
 0x436   : > { %1581 = vmatmul.msk.f32.vlgmr.msra.gmra.mxu1 %vm573_vm3, %v1110_v32 }
 0x43a   : > { %v739_v33 = vpop.f32.mrf.mxu1 }
 0x43b   : > { %v742_v34 = vsel %vm603_vm4, %v739_v33, -1.767767e+19 }
 0x43c   : > { %v743_v35 = vsel %vm573_vm3, %v742_v34, -inf }
 0x43d   : > { %744 = vmax.xlane.f32.xlu2 %v743_v35 }
 0x49b   : > { %v1952_v37 = vpop.f32.mrf.mxu1 }
 0x4a3   : > { %v1956_v39 = vpop.f32.mrf.mxu1 }
 0x4a5   : > { %v1068_v40 = vpop.f32.mrf.mxu0 }
 0x4a6   : > { %v1071_v41 = vsel %vm603_vm4, %v1068_v40, -1.767767e+19 }
 0x4a7   : > { %v1072_v42 = vsel %vm573_vm3, %v1071_v41, -inf }
 0x4a8   : > { %1073 = vmax.xlane.f32.xlu0 %v1072_v42 }
 0x4ab   : > { %v1017_v43 = vpop.f32.mrf.mxu1 }
 0x4ac   : > { %v1020_v44 = vpack.c.bf16 %v1017_v43, %v1956_v39 }
 0x4b0   : > { %v745_v45 = vpop.xlane.xlu2 %744 }
 0x4b1   : > { %v746_v46 = vsub.f32 %v742_v34, %v745_v45  ;;  %v1748_v45 = vmov 32.0  }
 0x4b3   : > { %v747_v47 = vmul.f32 1.442695, %v746_v46  ;;  %v1134_v48 = vpop.f32.mrf.mxu1 }
 0x4b4   : > { %v1137_v49 = vsel %vm674_vm5, %v1134_v48, -1.767767e+19 }
 0x4b5   : > { %1690 = vpow2.f32 %v747_v47  ;;  %v1138_v50 = vsel %vm573_vm3, %v1137_v49, -inf }
 0x4b6   : > { %1139 = vmax.xlane.f32.xlu1 %v1138_v50 }
 0x4bb   : > { %v1691_v51 = vpop.eup %1690 }
 0x4bc   : > { %v749_v14 = vsel %vm573_vm3, %v1691_v51, 0.0 }
 0x4bd   : > { %750 = vadd.xlane.f32.xlu0 %v749_v14 }
 0x4cf   : > { %1083 = vrot.lane.b32.xlu1 %v1855_v3, %s1747_s29 }
 0x4d1   : > { %754 = vrot.lane.b32.xlu0 %v1855_v3, %s1743_s21 }
 0x51b   : > { %v1074_v52 = vpop.xlane.xlu0 %1073 }
 0x51c   : > { %v1075_v53 = vsub.f32 %v1071_v41, %v1074_v52  ;;  %v520_v41 = vunpack.c.h.bf16 %v517_v26 }
 0x51e   : > { %v1076_v54 = vmul.f32 1.442695, %v1075_v53 }
 0x520   : > { %1692 = vpow2.f32 %v1076_v54 }
 0x526   : > { %v1693_v18 = vpop.eup %1692 }
 0x527   : > { %v1078_v55 = vsel %vm573_vm3, %v1693_v18, 0.0 }
 0x528   : > { %1079 = vadd.xlane.f32.xlu0 %v1078_v55 }
 0x529   : > { %v1140_v56 = vpop.xlane.xlu1 %1139 }
 0x52a   : > { %v1141_v57 = vsub.f32 %v1137_v49, %v1140_v56 }
 0x52c   : > { %v1142_v58 = vmul.f32 1.442695, %v1141_v57 }
 0x52e   : > { %1694 = vpow2.f32 %v1142_v58 }
 0x530   : > { %v751_v61 = vpop.xlane.xlu0 %750 }
 0x531   : > { %1696 = vrcp.f32 %v751_v61 }
 0x534   : > { %v1695_v59 = vpop.eup %1694 }
 0x535   : > { %v1144_v60 = vsel %vm573_vm3, %v1695_v59, 0.0 }
 0x536   : > { %1145 = vadd.xlane.f32.xlu2 %v1144_v60 }
 0x537   : > { %v1697_v62 = vpop.eup %1696 }
 0x538   : > { %v753_v0 = vmul.f32 %v1697_v62, %v1691_v51 }
 0x541   : > { %v1084_v3 = vpop.permute.xlu1 %1083 }
 0x542   : > { %1104 = vmatpush.msrb.mxu2 %v1084_v3  ;;  %v1618_v3 = vld [vmem:[%s2073_s7] sm:$0xff] }
 0x543   : > { %v755_v63 = vpop.permute.xlu0 %754 }
 0x544   : > { %775 = vmatpush.msrb.mxu3 %v755_v63  ;;  %1189 = vmatpush.bf16.msra.mxu2 %v1180_v17 }
 0x545   : > { %1564 = vmatmul.msk.f32.vlgmr.msrb.gmra.mxu3 %vm573_vm3, %v753_v0 }
 0x546   : > { %861 = vmatpush.bf16.msra.mxu3 %v852_v7 }
 0x54e   : > { %1149 = vrot.lane.b32.xlu2 %v1858_v4, %s1747_s29  ;;  %v1025_v4 = vsel %vm850_vm6, %v568_v9, 0 }
 0x54f   : > { %1034 = vmatpush.bf16.msrb.mxu3 %v1025_v4 }
 0x59b   : > { %v1080_v1 = vpop.xlane.xlu0 %1079 }
 0x59c   : > { %1698 = vrcp.f32 %v1080_v1 }
 0x5a2   : > { %v1699_v2 = vpop.eup %1698 }
 0x5a3   : > { %v1082_v5 = vmul.f32 %v1699_v2, %v1693_v18 }
 0x5a5   : > { %1579 = vmatmul.msk.f32.vlgmr.msrb.gmra.mxu2 %vm573_vm3, %v1082_v5 }
 0x5a9   : > { %v1146_v8 = vpop.xlane.xlu2 %1145 }
 0x5aa   : > { %1700 = vrcp.f32 %v1146_v8 }
 0x5ab   : > { %1702 = vrcp.f32 %v1748_v45 }
 0x5b0   : > { %v1701_v10 = vpop.eup %1700 }
 0x5b1   : > { %v1148_v11 = vmul.f32 %v1701_v10, %v1695_v59  ;;  %v1150_v12 = vpop.permute.xlu2 %1149  ;;  %v1703_v46 = vpop.eup %1702  ;;  %v1619_v59 = vld [vmem:[%s2073_s7 + $0x8] sm:$0xff] }
 0x5b2   : > { %1170 = vmatpush.msra.mxu0 %v1150_v12  ;;  %v1213_v47 = vmul.f32 32.0, %v1703_v46  ;;  %vm1217_vm7 = vweird.f32 %v1703_v46  ;;  %1299 = vmatpush.bf16.msrb.mxu1 %v1619_v59 }
 0x5b3   : > { %1582 = vmatmul.msk.f32.vlgmr.msra.gmra.mxu0 %vm573_vm3, %v1148_v11 }
 0x5b4   : > { %v1214_v48 = vsub.f32 1.0, %v1213_v47 }
 0x5b6   : > { %v1215_v49 = vmul.f32 %v1703_v46, %v1214_v48  ;;  %1300 = vmatpush.bf16.msrb.mxu1 %v1618_v3 }
 0x5c8   : > { %v777_v13 = vpop.f32.mrf.mxu3 }
 0x5c9   : > { %v846_v15 = vpack.c.bf16 %v1952_v37, %v777_v13 }
 0x5cb   : > { %1568 = vmatmul.msk.bf16.vlgmr.msra.gmra.mxu3 %vm573_vm3, %v846_v15 }
 0x5db   : > { %1576 = vmatmul.msk.bf16.vlgmr.msrb.gmra.mxu3 %vm573_vm3, %v1020_v44 }
 0x628   : > { %v1106_v19 = vpop.f32.mrf.mxu2 }
 0x630   : > { %v1172_v20 = vpop.f32.mrf.mxu0 }
 0x631   : > { %v1175_v21 = vpack.c.bf16 %v1172_v20, %v1106_v19 }
 0x633   : > { %1583 = vmatmul.msk.bf16.vlgmr.msra.gmra.mxu2 %vm573_vm3, %v1175_v21  ;;  %v1665_v21 = vld [vmem:[%s2072_s6] ss:$0 sm:$0xff]  ;;  %vm1424_vm3 = vcmask 257024  }
 0x64e   : > { %v863_v22 = vpop.f32.mrf.mxu3 }
 0x64f   : > { %v884_v25 = vadd.f32 %v1950_v36, %v863_v22 }
 0x656   : > { %v865_v23 = vpop.f32.mrf.mxu3 }
 0x657   : > { %v886_v34 = vadd.f32 %v1954_v38, %v865_v23  ;;  %v1216_v38 = vadd.f32 %v1703_v46, %v1215_v49 }
 0x659   : > { %v1999_v50 = vsel %vm1217_vm7, %v1703_v46, %v1216_v38 }
 0x65e   : > { %v1036_v24 = vpop.f32.mrf.mxu3 }
 0x65f   : > { %v1041_v27 = vadd.f32 %v1036_v24, %v884_v25 }
 0x666   : > { %v1038_v33 = vpop.f32.mrf.mxu3 }
 0x667   : > { %v1042_v37 = vadd.f32 %v1038_v33, %v886_v34  ;;  %v1666_v33 = vld [vmem:[%s2074_s8] ss:$0 sm:$0xff] }
 0x6b6   : > { %v1191_v29 = vpop.f32.mrf.mxu2 }
 0x6b7   : > { %v1196_v30 = vadd.f32 %v1191_v29, %v1041_v27  ;;  %v1622_v29 = vld [vmem:[%s2075_s9 + $0x10] sm:$0xff] }
 0x6b9   : > { %v1202_v32 = vadd.f32 %v1663_v28, %v1196_v30  ;;  %v1621_v30 = vld [vmem:[%s2075_s9 + $0x8] sm:$0xff] }
 0x6bb   : > { %v1204_v35 = vadd.f32 %v1202_v32, %v519_v31  ;;  %v1620_v31 = vld [vmem:[%s2075_s9] sm:$0xff] }
 0x6bd   : > { %v1206_v39 = vsel %vm542_vm0, %v1204_v35, 0.0 }
 0x6be   : > { %v1193_v40 = vpop.f32.mrf.mxu2  ;;  %1207 = vadd.xlane.f32.xlu1 %v1206_v39 }
 0x6bf   : > { %v1197_v36 = vadd.f32 %v1193_v40, %v1042_v37 }
 0x6c1   : > { %v1203_v42 = vadd.f32 %v1663_v28, %v1197_v36  ;;  %v1623_v28 = vld [vmem:[%s2075_s9 + $0x18] sm:$0xff] }
 0x6c2   : > { %1354 = vmatpush.bf16.msra.mxu3 %v1623_v28 }
 0x6c3   : > { %v1205_v43 = vadd.f32 %v1203_v42, %v520_v41  ;;  %v1667_v41 = vld [vmem:[%s2076_s10] ss:$0 sm:$0xff] }
 0x6c5   : > { %v1209_v44 = vsel %vm542_vm0, %v1205_v43, 0.0 }
 0x6c6   : > { %1210 = vadd.xlane.f32.xlu2 %v1209_v44  ;;  %1355 = vmatpush.bf16.msra.mxu3 %v1622_v29 }
 0x6ca   : > { %1356 = vmatpush.bf16.msra.mxu3 %v1621_v30 }
 0x6ce   : > { %1357 = vmatpush.bf16.msra.mxu3 %v1620_v31 }
 0x731   : > { %v1208_v51 = vpop.xlane.xlu1 %1207 }
 0x732   : > { %v1219_v14 = vmul.f32 %v1999_v50, %v1208_v51 }
 0x734   : > { %v1221_v52 = vsub.f32 %v1204_v35, %v1219_v14 }
 0x736   : > { %v1223_v53 = vmul.f32 %v1221_v52, %v1221_v52 }
 0x738   : > { %v1225_v54 = vsel %vm542_vm0, %v1223_v53, 0.0 }
 0x739   : > { %v1211_v18 = vpop.xlane.xlu2 %1210  ;;  %1226 = vadd.xlane.f32.xlu0 %v1225_v54 }
 0x73a   : > { %v1220_v55 = vmul.f32 %v1999_v50, %v1211_v18 }
 0x73c   : > { %v1222_v56 = vsub.f32 %v1205_v43, %v1220_v55 }
 0x73e   : > { %v1224_v57 = vmul.f32 %v1222_v56, %v1222_v56 }
 0x740   : > { %v1228_v58 = vsel %vm542_vm0, %v1224_v57, 0.0 }
 0x741   : > { %1229 = vadd.xlane.f32.xlu0 %v1228_v58 }
 0x7ac   : > { %v1227_v60 = vpop.xlane.xlu0 %1226 }
 0x7ad   : > { %v1231_v61 = vmul.f32 %v1227_v60, %v1999_v50 }
 0x7af   : > { %v1233_v62 = vadd.f32 1e-05, %v1231_v61 }
 0x7b1   : > { %1704 = vrsqrt.f32 %v1233_v62  ;;  %vm1241_vm9 = vweird.f32 %v1233_v62 }
 0x7b4   : > { %v1230_v63 = vpop.xlane.xlu0 %1229 }
 0x7b5   : > { %v1232_v0 = vmul.f32 %v1230_v63, %v1999_v50 }
 0x7b7   : > { %v1705_v1 = vpop.eup %1704  ;;  %v1234_v2 = vadd.f32 1e-05, %v1232_v0 }
 0x7b8   : > { %v1236_v5 = vmul.f32 %v1705_v1, %v1233_v62  ;;  %vm1242_vm8 = vweird.f32 %v1705_v1 }
 0x7b9   : > { %1706 = vrsqrt.f32 %v1234_v2  ;;  %vm1243_vm10 = vmor %vm1241_vm9, %vm1242_vm8  ;;  %vm1251_vm12 = vweird.f32 %v1234_v2 }
 0x7ba   : > { %v1237_v6 = vmul.f32 %v1705_v1, %v1236_v5 }
 0x7bc   : > { %v1238_v7 = vmul.f32 0.5, %v1237_v6 }
 0x7be   : > { %v1239_v8 = vsub.f32 1.5, %v1238_v7 }
 0x7bf   : > { %v1707_v9 = vpop.eup %1706 }
 0x7c0   : > { %v1240_v4 = vmul.f32 %v1705_v1, %v1239_v8  ;;  %v1246_v10 = vmul.f32 %v1707_v9, %v1234_v2  ;;  %vm1252_vm11 = vweird.f32 %v1707_v9 }
 0x7c1   : > { %vm1253_vm13 = vmor %vm1251_vm12, %vm1252_vm11 }
 0x7c2   : > { %v1247_v11 = vmul.f32 %v1707_v9, %v1246_v10  ;;  %v1244_v12 = vsel %vm1243_vm10, %v1705_v1, %v1240_v4  ;;  %v1669_v10 = vld [vmem:[%s2078_s12] ss:$0 sm:$0xff] }
 0x7c3   : > { %v1255_v17 = vmul.f32 %v1244_v12, %v1221_v52 }
 0x7c4   : > { %v1248_v13 = vmul.f32 0.5, %v1247_v11 }
 0x7c5   : > { %v1261_v22 = vmul.f32 %v1664_v16, %v1255_v17 }
 0x7c6   : > { %v1249_v15 = vsub.f32 1.5, %v1248_v13 }
 0x7c7   : > { %v1267_v25 = vadd.f32 %v1665_v21, %v1261_v22 }
 0x7c8   : > { %v1250_v19 = vmul.f32 %v1707_v9, %v1249_v15 }
 0x7ca   : > { %v1254_v20 = vsel %vm1253_vm13, %v1707_v9, %v1250_v19  ;;  %v1668_v9 = vld [vmem:[%s2077_s11] ss:$0 sm:$0xff] }
 0x7cb   : > { %v1256_v23 = vmul.f32 %v1254_v20, %v1222_v56 }
 0x7cd   : > { %v1262_v24 = vmul.f32 %v1664_v16, %v1256_v23 }
 0x7cf   : > { %v1268_v26 = vadd.f32 %v1665_v21, %v1262_v24 }
 0x7d1   : > { %v1269_v27 = vpack.c.bf16 %v1268_v26, %v1267_v25 }
 0x7d3   : > { %1592 = vmatmul.msk.bf16.vlgmr.msrb.gmra.mxu1 %vm542_vm0, %v1269_v27 }
 0x850   : > { %v1302_v32 = vpop.f32.mrf.mxu1 }
 0x851   : > { %v1303_v34 = vadd.f32 %v1666_v33, %v1302_v32 }
 0x853   : > { %v1307_v39 = vmax.f32 %v1303_v34, 0.0 }
 0x858   : > { %v1304_v35 = vpop.f32.mrf.mxu1 }
 0x859   : > { %v1305_v37 = vadd.f32 %v1666_v33, %v1304_v35 }
 0x85b   : > { %v1308_v40 = vmax.f32 %v1305_v37, 0.0 }
 0x85d   : > { %v1309_v36 = vpack.c.bf16 %v1308_v40, %v1307_v39 }
 0x85f   : > { %1609 = vmatmul.msk.bf16.vlgmr.msra.gmra.mxu3 %vm1346_vm14, %v1309_v36 }
 0x8e2   : > { %v1359_v42 = vpop.f32.mrf.mxu3 }
 0x8e3   : > { %v1360_v43 = vadd.f32 %v1667_v41, %v1359_v42 }
 0x8e5   : > { %v1364_v44 = vadd.f32 %v1360_v43, %v1267_v25 }
 0x8e7   : > { %v1366_v45 = vsel %vm542_vm0, %v1364_v44, 0.0 }
 0x8e8   : > { %1367 = vadd.xlane.f32.xlu0 %v1366_v45 }
 0x8ea   : > { %v1361_v46 = vpop.f32.mrf.mxu3 }
 0x8eb   : > { %v1362_v47 = vadd.f32 %v1667_v41, %v1361_v46 }
 0x8ed   : > { %v1365_v48 = vadd.f32 %v1362_v47, %v1268_v26 }
 0x8ef   : > { %v1369_v49 = vsel %vm542_vm0, %v1365_v48, 0.0 }
 0x8f0   : > { %1370 = vadd.xlane.f32.xlu0 %v1369_v49 }
 0x95b   : > { %v1368_v38 = vpop.xlane.xlu0 %1367 }
 0x95c   : > { %v1372_v51 = vmul.f32 %v1368_v38, %v1999_v50 }
 0x95e   : > { %v1374_v14 = vsub.f32 %v1364_v44, %v1372_v51 }
 0x960   : > { %v1376_v52 = vmul.f32 %v1374_v14, %v1374_v14 }
 0x962   : > { %v1378_v53 = vsel %vm542_vm0, %v1376_v52, 0.0 }
 0x963   : > { %1379 = vadd.xlane.f32.xlu1 %v1378_v53  ;;  %v1371_v54 = vpop.xlane.xlu0 %1370 }
 0x964   : > { %v1373_v18 = vmul.f32 %v1371_v54, %v1999_v50 }
 0x966   : > { %v1375_v55 = vsub.f32 %v1365_v48, %v1373_v18 }
 0x968   : > { %v1377_v56 = vmul.f32 %v1375_v55, %v1375_v55 }
 0x96a   : > { %v1381_v57 = vsel %vm542_vm0, %v1377_v56, 0.0 }
 0x96b   : > { %1382 = vadd.xlane.f32.xlu2 %v1381_v57 }
 0x9d6   : > { %v1380_v58 = vpop.xlane.xlu1 %1379 }
 0x9d7   : > { %v1384_v59 = vmul.f32 %v1380_v58, %v1999_v50 }
 0x9d9   : > { %v1386_v60 = vadd.f32 1e-05, %v1384_v59 }
 0x9db   : > { %1708 = vrsqrt.f32 %v1386_v60  ;;  %vm1394_vm0 = vweird.f32 %v1386_v60 }
 0x9de   : > { %v1383_v61 = vpop.xlane.xlu2 %1382 }
 0x9df   : > { %v1385_v62 = vmul.f32 %v1383_v61, %v1999_v50 }
 0x9e1   : > { %v1709_v3 = vpop.eup %1708  ;;  %v1387_v63 = vadd.f32 1e-05, %v1385_v62 }
 0x9e2   : > { %v1389_v0 = vmul.f32 %v1709_v3, %v1386_v60  ;;  %vm1395_vm15 = vweird.f32 %v1709_v3 }
 0x9e3   : > { %1710 = vrsqrt.f32 %v1387_v63  ;;  %vm1396_vm1 = vmor %vm1394_vm0, %vm1395_vm15  ;;  %vm1404_vm4 = vweird.f32 %v1387_v63 }
 0x9e4   : > { %v1390_v1 = vmul.f32 %v1709_v3, %v1389_v0 }
 0x9e6   : > { %v1391_v2 = vmul.f32 0.5, %v1390_v1 }
 0x9e8   : > { %v1392_v5 = vsub.f32 1.5, %v1391_v2 }
 0x9e9   : > { %v1711_v6 = vpop.eup %1710 }
 0x9ea   : > { %v1393_v7 = vmul.f32 %v1709_v3, %v1392_v5  ;;  %v1399_v8 = vmul.f32 %v1711_v6, %v1387_v63  ;;  %vm1405_vm2 = vweird.f32 %v1711_v6 }
 0x9eb   : > { %vm1406_vm5 = vmor %vm1404_vm4, %vm1405_vm2 }
 0x9ec   : > { %v1397_v4 = vsel %vm1396_vm1, %v1709_v3, %v1393_v7  ;;  %v1400_v50 = vmul.f32 %v1711_v6, %v1399_v8 }
 0x9ed   : > { %v1408_v11 = vmul.f32 %v1397_v4, %v1374_v14 }
 0x9ee   : > { %v1401_v12 = vmul.f32 0.5, %v1400_v50 }
 0x9ef   : > { %v1414_v13 = vmul.f32 %v1668_v9, %v1408_v11 }
 0x9f0   : > { %v1402_v15 = vsub.f32 1.5, %v1401_v12 }
 0x9f1   : > { %v1420_v16 = vadd.f32 %v1669_v10, %v1414_v13 }
 0x9f2   : > { %v1403_v17 = vmul.f32 %v1711_v6, %v1402_v15 }
 0x9f3   : > { %v1422_v19 = vpack.c.bf16 %v1420_v16, %v1420_v16 }
 0x9f4   : > { %v1407_v20 = vsel %vm1406_vm5, %v1711_v6, %v1403_v17 }
 0x9f5   : > { %1425 = vst.msk [vmem:[%s514_s24] sm:$0xf] %vm1424_vm3, %v1422_v19  ;;  %v1409_v21 = vmul.f32 %v1407_v20, %v1375_v55 }
 0x9f7   : > { %v1415_v22 = vmul.f32 %v1668_v9, %v1409_v21 }
 0x9f9   : > { %v1421_v23 = vadd.f32 %v1669_v10, %v1415_v22 }
 0x9fb   : > { %v1423_v24 = vpack.c.bf16 %v1421_v23, %v1421_v23 }
 0x9fd   : > { %1426 = vst.msk [vmem:[%s514_s24 + $0x4] sm:$0xf] %vm1424_vm3, %v1423_v24 }
 0x9fe PF: > { %s23_s27 = sadd.s32 1, %s1734_s27   ;;  %s2080_s25 = smov %s1730_s26 }
 0x9ff   : > { %p20_p5 = scmp.ge.s32.totalorder %s23_s27, 4   ;;  %s2081_s26 = smov %s2083_s28 }
 0xa01   :  { %22 = sbr.rel (!%p20_p5) target bundleno = 2 (0x2), region = 105 }

</bundles_post_ra>
